<compile_context>
chip_gen: v7x
topology: tpu7x:2x2x1
jax: 0.10.0
libtpu: 0.0.40
codegen_flags: <defaults>
</compile_context>

<pallas_src>
import math

import jax
import jax.numpy as jnp
from jax.experimental import pallas as pl
from jax.experimental.pallas import tpu as pltpu

# -------------------- problem sizes (small, consistent with the module) --------------------
B = 64            # decode streams per call (module uses 128; kept modest for the demo)
T = 4             # decode steps processed by one kernel launch (time loop lives in-kernel)
V = 32            # output_vocab_size
E = 64            # embed_size
H = 64            # hidden_size
L = 3             # num_decoder_layers (== num_encoder_layers)
K2 = 2 * H        # fused contraction dim ([x | h]) == 128 -> exactly one MXU pass
G4 = 4 * H        # gate width
VPAD = 128        # logits last dim padded to a full lane group for unmasked stores
B_SHARD = 32      # batch rows per grid shard ("parallel" axis -> both TCs on v7x)
NS = B // B_SHARD

assert V <= H, "layer-0 one-hot block must fit in the first H lanes of the fused input"
assert B % B_SHARD == 0 and B_SHARD % 16 == 0   # 16: bf16 sublane packing


# -------------------- Pallas kernel --------------------
def decoder_kernel(tok_ref, w_ref, b_ref, w_out_ref, b_out_ref, hc_in_ref,
                   logits_ref, hc_out_ref, xh_ref, hc_ref):
    """One (batch-shard, time-step) grid point of the L-layer LSTM decoder.

    tok_ref    : (1, 1, Bsh, 1) int32   token ids for this (step, shard)
    w_ref      : (L, 2H, 4H)            fused [emb-folded-ih ; hh] weights, gate order [i,f,o,g]
    b_ref      : (L, 1, 4H)     f32     folded b_ih + b_hh
    w_out_ref  : (H, VPAD)              output projection (zero-padded past V)
    b_out_ref  : (1, VPAD)      f32
    hc_in_ref  : (L, Bsh, 2H)   f32     packed [h | c] initial state for this shard
    logits_ref : (1, Bsh, VPAD) f32     per-step logits block
    hc_out_ref : (L, Bsh, 2H)   f32     final packed state for this shard (aliased with hc_in)
    xh_ref     : (Bsh, 2H)      scratch fused [x | h] MXU operand (compute dtype)
    hc_ref     : (L, Bsh, 2H)   f32     scratch: state carried across time steps
    """
    hid = hc_in_ref.shape[-1] // 2
    n_layers = hc_in_ref.shape[0]
    t = pl.program_id(1)
    cdt = xh_ref.dtype

    @pl.when(t == 0)
    def _():
        hc_ref[...] = hc_in_ref[...]          # load this shard's carry at its first step

    # Layer-0 "input half": one-hot over the first `hid` lanes (token ids < V <= hid).
    tok = tok_ref[0, 0]                                                # (Bsh, 1) int32
    lane = jax.lax.broadcasted_iota(jnp.int32, (tok.shape[0], hid), 1)
    xh_ref[:, :hid] = (lane == tok).astype(jnp.float32).astype(cdt)    # exact in bf16 too

    x = None
    for l in range(n_layers):
        hc_l = hc_ref[l]                                               # (Bsh, 2H) f32, [h | c]
        xh_ref[:, hid:] = hc_l[:, :hid].astype(cdt)                    # h_l into the hh half
        # Single fused K=128 MXU matmul per layer; f32 accumulation, f32 gate math.
        gates = (jnp.dot(xh_ref[...], w_ref[l], preferred_element_type=jnp.float32)
                 + b_ref[l])                                           # (Bsh, 4H), [i, f, o, g]
        sig_if = jax.nn.sigmoid(gates[:, :2 * hid])                    # whole first 128-lane vreg
        o_g = jax.nn.sigmoid(gates[:, 2 * hid:3 * hid])                # 64-lane halves of vreg 1
        g_g = jnp.tanh(gates[:, 3 * hid:])
        c_new = sig_if[:, hid:] * hc_l[:, hid:] + sig_if[:, :hid] * g_g
        h_new = o_g * jnp.tanh(c_new)
        hc_ref[l, :, :hid] = h_new                                     # half-writes, no concat
        hc_ref[l, :, hid:] = c_new
        x = h_new.astype(cdt)
        if l + 1 < n_layers:
            xh_ref[:, :hid] = x                                        # input half for next layer
    # TODO(synk): inter-layer dropout (p=0.4) is a train-time-only op; inference semantics used.

    logits_ref[0] = (jnp.dot(x, w_out_ref[...], preferred_element_type=jnp.float32)
                     + b_out_ref[...])                                 # (Bsh, VPAD) lane-dense

    @pl.when(t == pl.num_programs(1) - 1)
    def _():
        hc_out_ref[...] = hc_ref[...]                                  # final state writeback


# -------------------- glue / wrapper --------------------
def convert_encoder_hidden(hidden, num_decoder_layers):
    """jnp replica of Decoder._convert_encoder_hidden for the LSTM case."""
    h, c = hidden
    n_enc = h.shape[0]
    if n_enc == num_decoder_layers:
        return hidden
    if n_enc >= num_decoder_layers:
        return (h[-num_decoder_layers:], c[-num_decoder_layers:])
    pad = num_decoder_layers - n_enc
    h_new = jnp.concatenate([h] + [h[-1:]] * pad, axis=0)
    c_new = jnp.concatenate([c] + [c[-1:]] * pad, axis=0)
    return (h_new, c_new)


def _reorder_gates(w):
    """Reorder last-dim gate blocks from PyTorch [i, f, g, o] to kernel order [i, f, o, g]."""
    i, f, g, o = jnp.split(w, 4, axis=-1)
    return jnp.concatenate([i, f, o, g], axis=-1)


def fuse_params(params, compute_dtype=jnp.float32):
    """One-time host-side weight prep: fold embedding into layer 0, stack ih/hh, fold biases.

    The emb @ W_ih0^T fold and padding are done in f32, then cast to compute_dtype (bf16 halves
    the resident-weight bytes and hits native MXU rate; biases stay f32 for f32 gate math).
    """
    w_layers, b_layers = [], []
    for l in range(L):
        w_ih_t = params[f"w_ih{l}"].T                               # (in, 4H)
        w_hh_t = params[f"w_hh{l}"].T                               # (H, 4H)
        if l == 0:
            top = params["emb"] @ w_ih_t                            # one_hot @ (emb @ W_ih0^T)
            if V < H:
                top = jnp.concatenate(
                    [top, jnp.zeros((H - V, G4), jnp.float32)], axis=0)      # (H, 4H)
        else:
            top = w_ih_t
        w_layers.append(_reorder_gates(jnp.concatenate([top, w_hh_t], axis=0)))   # (2H, 4H)
        b_layers.append(_reorder_gates(
            (params[f"b_ih{l}"] + params[f"b_hh{l}"]).reshape(1, G4)))
    w_out_p = jnp.zeros((H, VPAD), jnp.float32).at[:, :V].set(params["w_out"].T)
    b_out_p = jnp.zeros((1, VPAD), jnp.float32).at[:, :V].set(params["b_out"].reshape(1, V))
    return {
        "w_stack": jnp.stack(w_layers).astype(compute_dtype),      # (L, 2H, 4H)
        "b_stack": jnp.stack(b_layers),                            # (L, 1, 4H) f32
        "w_out": w_out_p.astype(compute_dtype),                    # (H, VPAD)
        "b_out": b_out_p,                                          # (1, VPAD) f32
    }


@jax.jit
def decoder_forward(tokens, hidden, fused):
    """Pallas-backed forward. tokens: (B, T) int32, hidden: ((L,B,H),(L,B,H)).

    Returns (logits (B, T, V), (h_n, c_n)) exactly like the PyTorch forward (eval mode).
    """
    h0, c0 = convert_encoder_hidden(hidden, L)
    hc0 = jnp.concatenate([h0, c0], axis=-1)                        # (L, B, 2H) packed [h | c]
    seq = tokens.shape[1]
    tok_r = tokens.T.reshape(seq, NS, B_SHARD, 1)                   # (T, NS, Bsh, 1)
    cdt = fused["w_stack"].dtype

    nbytes = lambda a: a.size * a.dtype.itemsize
    cost = pl.CostEstimate(
        flops=2 * seq * B * (L * K2 * G4 + H * VPAD),
        transcendentals=seq * B * L * (G4 + H),
        bytes_accessed=(nbytes(tok_r) + nbytes(fused["w_stack"]) + nbytes(fused["b_stack"])
                        + nbytes(fused["w_out"]) + nbytes(fused["b_out"])
                        + 2 * nbytes(hc0) + seq * B * VPAD * 4),
    )

    logits_pad, hc_n = pl.pallas_call(
        decoder_kernel,
        grid=(NS, seq),
        in_specs=[
            pl.BlockSpec((1, 1, B_SHARD, 1), lambda s, t: (t, s, 0, 0)),   # tokens, per step/shard
            pl.BlockSpec((L, K2, G4), lambda s, t: (0, 0, 0)),             # w_stack (resident)
            pl.BlockSpec((L, 1, G4), lambda s, t: (0, 0, 0)),              # b_stack (resident)
            pl.BlockSpec((H, VPAD), lambda s, t: (0, 0)),                  # w_out   (resident)
            pl.BlockSpec((1, VPAD), lambda s, t: (0, 0)),                  # b_out   (resident)
            pl.BlockSpec((L, B_SHARD, 2 * H), lambda s, t: (0, s, 0)),     # hc_in, per shard
        ],
        out_specs=(
            pl.BlockSpec((1, B_SHARD, VPAD), lambda s, t: (t, s, 0)),      # logits, per step
            pl.BlockSpec((L, B_SHARD, 2 * H), lambda s, t: (0, s, 0)),     # hc_out, per shard
        ),
        out_shape=(
            jax.ShapeDtypeStruct((seq, B, VPAD), jnp.float32),
            jax.ShapeDtypeStruct((L, B, 2 * H), jnp.float32),
        ),
        scratch_shapes=[
            pltpu.VMEM((B_SHARD, 2 * H), cdt),              # fused [x | h] MXU operand
            pltpu.VMEM((L, B_SHARD, 2 * H), jnp.float32),   # state carried across time steps
        ],
        input_output_aliases={5: 1},                         # hc_in buffer reused for hc_out
        compiler_params=pltpu.CompilerParams(
            dimension_semantics=("parallel", "arbitrary"),
            vmem_limit_bytes=32 * 1024 * 1024,
        ),
        cost_estimate=cost,
    )(tok_r, fused["w_stack"], fused["b_stack"], fused["w_out"], fused["b_out"], hc0)

    logits = jnp.transpose(logits_pad, (1, 0, 2))[:, :, :V]          # (B, T, V)
    return logits, (hc_n[:, :, :H], hc_n[:, :, H:])


# -------------------- pure-JAX reference (for correctness check) --------------------
def decoder_reference(tokens, hidden, params):
    h0, c0 = convert_encoder_hidden(hidden, L)
    h = [h0[l] for l in range(L)]
    c = [c0[l] for l in range(L)]
    outs = []
    for t in range(tokens.shape[1]):
        x = params["emb"][tokens[:, t]]                     # (B, E)
        for l in range(L):
            gates = (x @ params[f"w_ih{l}"].T + params[f"b_ih{l}"]
                     + h[l] @ params[f"w_hh{l}"].T + params[f"b_hh{l}"])
            i_g = jax.nn.sigmoid(gates[:, 0 * H:1 * H])
            f_g = jax.nn.sigmoid(gates[:, 1 * H:2 * H])
            g_g = jnp.tanh(gates[:, 2 * H:3 * H])
            o_g = jax.nn.sigmoid(gates[:, 3 * H:4 * H])
            c[l] = f_g * c[l] + i_g * g_g
            h[l] = o_g * jnp.tanh(c[l])
            x = h[l]
        outs.append(x @ params["w_out"].T + params["b_out"])
    return jnp.stack(outs, axis=1), (jnp.stack(h), jnp.stack(c))


# -------------------- deterministic parameter init (PyTorch-like) --------------------
def init_params(key):
    params = {}
    bound = 1.0 / math.sqrt(H)
    key, k = jax.random.split(key)
    params["emb"] = jax.random.normal(k, (V, E), jnp.float32)
    for l in range(L):
        in_dim = E if l == 0 else H
        key, k1, k2, k3, k4 = jax.random.split(key, 5)
        params[f"w_ih{l}"] = jax.random.uniform(k1, (4 * H, in_dim), jnp.float32, -bound, bound)
        params[f"w_hh{l}"] = jax.random.uniform(k2, (4 * H, H), jnp.float32, -bound, bound)
        params[f"b_ih{l}"] = jax.random.uniform(k3, (4 * H,), jnp.float32, -bound, bound)
        params[f"b_hh{l}"] = jax.random.uniform(k4, (4 * H,), jnp.float32, -bound, bound)
    key, k1, k2 = jax.random.split(key, 3)
    params["w_out"] = jax.random.uniform(k1, (V, H), jnp.float32, -bound, bound)
    params["b_out"] = jax.random.uniform(k2, (V,), jnp.float32, -bound, bound)
    return params


if __name__ == "__main__":
    key = jax.random.PRNGKey(0)
    params = init_params(key)

    key, k_tok, k_h, k_c = jax.random.split(key, 4)
    tokens = jax.random.randint(k_tok, (B, T), 0, V, dtype=jnp.int32)
    # Guard for the embedding-fold one-hot trick (review correctness concern).
    assert int(tokens.min()) >= 0 and int(tokens.max()) < V
    h_enc = 0.1 * jax.random.normal(k_h, (L, B, H), jnp.float32)
    c_enc = 0.1 * jax.random.normal(k_c, (L, B, H), jnp.float32)

    ref_logits, (ref_h, ref_c) = decoder_reference(tokens, (h_enc, c_enc), params)

    # --- f32 weights: strict functional check (tolerance absorbs XLA default matmul precision) ---
    fused_f32 = fuse_params(params, jnp.float32)
    logits, (h_n, c_n) = decoder_forward(tokens, (h_enc, c_enc), fused_f32)
    jax.block_until_ready((logits, h_n, c_n))
    assert logits.shape == (B, T, V) and h_n.shape == (L, B, H) and c_n.shape == (L, B, H)
    assert jnp.allclose(logits, ref_logits, rtol=5e-3, atol=5e-3)
    assert jnp.allclose(h_n, ref_h, rtol=5e-3, atol=5e-3)
    assert jnp.allclose(c_n, ref_c, rtol=5e-3, atol=5e-3)

    # --- bf16 weights (perf config: half the resident-weight bytes, native MXU rate) ---
    fused_bf16 = fuse_params(params, jnp.bfloat16)
    logits_b, (h_b, c_b) = decoder_forward(tokens, (h_enc, c_enc), fused_bf16)
    jax.block_until_ready((logits_b, h_b, c_b))
    assert jnp.allclose(logits_b, ref_logits, rtol=2e-2, atol=2e-2)
    assert jnp.allclose(h_b, ref_h, rtol=2e-2, atol=2e-2)
    assert jnp.allclose(c_b, ref_c, rtol=2e-2, atol=2e-2)

    print("KERNEL_OK")
</pallas_src>

<mosaic_0001>
module attributes {stable_mosaic.version = 11 : i64} {
  func.func @decoder_kernel(%arg0: i32, %arg1: i32, %arg2: memref<1x1x32x1xi32, #tpu.memory_space<vmem>>, %arg3: memref<3x128x256xf32, #tpu.memory_space<vmem>>, %arg4: memref<3x1x256xf32, #tpu.memory_space<vmem>>, %arg5: memref<64x128xf32, #tpu.memory_space<vmem>>, %arg6: memref<1x128xf32, #tpu.memory_space<vmem>>, %arg7: memref<3x32x128xf32, #tpu.memory_space<vmem>>, %arg8: memref<1x32x128xf32, #tpu.memory_space<vmem>>, %arg9: memref<3x32x128xf32, #tpu.memory_space<vmem>>, %arg10: memref<32x128xf32, #tpu.memory_space<vmem>>, %arg11: memref<3x32x128xf32, #tpu.memory_space<vmem>>) attributes {dimension_semantics = [#tpu.dimension_semantics<parallel>, #tpu.dimension_semantics<arbitrary>], iteration_bounds = array<i64: 2, 4>, scalar_prefetch = 0 : i64, scratch_operands = 2 : i64, tpu.core_type = #tpu.core_type<tc>, window_params = [{transform_indices = @transform_0, window_bounds = array<i64: 1, 1, 32, 1>}, {pipeline_mode = #tpu.pipeline_mode<synchronous>, transform_indices = @transform_1, window_bounds = array<i64: 3, 128, 256>}, {pipeline_mode = #tpu.pipeline_mode<synchronous>, transform_indices = @transform_2, window_bounds = array<i64: 3, 1, 256>}, {pipeline_mode = #tpu.pipeline_mode<synchronous>, transform_indices = @transform_3, window_bounds = array<i64: 64, 128>}, {pipeline_mode = #tpu.pipeline_mode<synchronous>, transform_indices = @transform_4, window_bounds = array<i64: 1, 128>}, {transform_indices = @transform_5, window_bounds = array<i64: 3, 32, 128>}, {transform_indices = @transform_6, window_bounds = array<i64: 1, 32, 128>}, {transform_indices = @transform_7, window_bounds = array<i64: 3, 32, 128>}]} {
    %c0_i32 = arith.constant 0 : i32
    %0 = arith.cmpi eq, %arg1, %c0_i32 : i32
    %1 = arith.extui %0 : i1 to i32
    %c0_i32_0 = arith.constant 0 : i32
    %2 = arith.cmpi ne, %1, %c0_i32_0 : i32
    scf.if %2 {
      %c0_81 = arith.constant 0 : index
      %c0_82 = arith.constant 0 : index
      %c0_83 = arith.constant 0 : index
      %144 = vector.load %arg7[%c0_81, %c0_82, %c0_83] : memref<3x32x128xf32, #tpu.memory_space<vmem>>, vector<3x32x128xf32>
      %c0_84 = arith.constant 0 : index
      %c0_85 = arith.constant 0 : index
      %c0_86 = arith.constant 0 : index
      %145 = vector.load %arg11[%c0_84, %c0_85, %c0_86] : memref<3x32x128xf32, #tpu.memory_space<vmem>>, vector<3x32x128xf32>
      tpu.vector_store %arg11[%c0_84, %c0_85, %c0_86], %144 {strides = array<i32>} : memref<3x32x128xf32, #tpu.memory_space<vmem>>, vector<3x32x128xf32>,
    } else {
    }
    %c0 = arith.constant 0 : index
    %c0_1 = arith.constant 0 : index
    %c0_2 = arith.constant 0 : index
    %c0_3 = arith.constant 0 : index
    %3 = vector.load %arg2[%c0, %c0_1, %c0_2, %c0_3] : memref<1x1x32x1xi32, #tpu.memory_space<vmem>>, vector<1x1x32x1xi32>
    %4 = vector.shape_cast %3 : vector<1x1x32x1xi32> to vector<32x1xi32>
    %5 = tpu.iota {dimensions = array<i32: 1>} : vector<32x64xi32>
    %6 = vector.broadcast %4 : vector<32x1xi32> to vector<32x64xi32>
    %7 = arith.cmpi eq, %5, %6 : vector<32x64xi32>
    %8 = arith.extui %7 : vector<32x64xi1> to vector<32x64xi32>
    %9 = arith.sitofp %8 : vector<32x64xi32> to vector<32x64xf32>
    %c0_4 = arith.constant 0 : index
    %c0_5 = arith.constant 0 : index
    %10 = vector.load %arg10[%c0_4, %c0_5] : memref<32x128xf32, #tpu.memory_space<vmem>>, vector<32x64xf32>
    tpu.vector_store %arg10[%c0_4, %c0_5], %9 {strides = array<i32>} : memref<32x128xf32, #tpu.memory_space<vmem>>, vector<32x64xf32>,
    %c0_6 = arith.constant 0 : index
    %c0_7 = arith.constant 0 : index
    %c0_8 = arith.constant 0 : index
    %11 = vector.load %arg11[%c0_6, %c0_7, %c0_8] : memref<3x32x128xf32, #tpu.memory_space<vmem>>, vector<1x32x128xf32>
    %12 = vector.shape_cast %11 : vector<1x32x128xf32> to vector<32x128xf32>
    %13 = vector.extract_strided_slice %12 {offsets = [0, 0], sizes = [32, 64], strides = [1, 1]} : vector<32x128xf32> to vector<32x64xf32>
    %c0_9 = arith.constant 0 : index
    %c64 = arith.constant 64 : index
    %14 = vector.load %arg10[%c0_9, %c64] : memref<32x128xf32, #tpu.memory_space<vmem>>, vector<32x64xf32>
    tpu.vector_store %arg10[%c0_9, %c64], %13 {strides = array<i32>} : memref<32x128xf32, #tpu.memory_space<vmem>>, vector<32x64xf32>,
    %c0_10 = arith.constant 0 : index
    %c0_11 = arith.constant 0 : index
    %15 = vector.load %arg10[%c0_10, %c0_11] : memref<32x128xf32, #tpu.memory_space<vmem>>, vector<32x128xf32>
    %c0_12 = arith.constant 0 : index
    %c0_13 = arith.constant 0 : index
    %c0_14 = arith.constant 0 : index
    %16 = vector.load %arg3[%c0_12, %c0_13, %c0_14] : memref<3x128x256xf32, #tpu.memory_space<vmem>>, vector<1x128x256xf32>
    %17 = vector.shape_cast %16 : vector<1x128x256xf32> to vector<128x256xf32>
    %cst = arith.constant dense<0.000000e+00> : vector<32x256xf32>
    %18 = tpu.matmul %15, %17, %cst {dimension_numbers = #tpu.dot_dimension_numbers<[1], [0], [0], [1], [0, 0, 1, 1], [], []>} : vector<32x128xf32>, vector<128x256xf32>, vector<32x256xf32> -> vector<32x256xf32>
    %c0_15 = arith.constant 0 : index
    %c0_16 = arith.constant 0 : index
    %c0_17 = arith.constant 0 : index
    %19 = vector.load %arg4[%c0_15, %c0_16, %c0_17] : memref<3x1x256xf32, #tpu.memory_space<vmem>>, vector<1x1x256xf32>
    %20 = vector.shape_cast %19 : vector<1x1x256xf32> to vector<1x256xf32>
    %21 = vector.broadcast %20 : vector<1x256xf32> to vector<32x256xf32>
    %22 = arith.addf %18, %21 : vector<32x256xf32>
    %23 = vector.extract_strided_slice %22 {offsets = [0, 0], sizes = [32, 128], strides = [1, 1]} : vector<32x256xf32> to vector<32x128xf32>
    %24 = arith.negf %23 : vector<32x128xf32>
    %25 = math.exp %24 : vector<32x128xf32>
    %cst_18 = arith.constant 1.000000e+00 : f32
    %26 = vector.broadcast %cst_18 : f32 to vector<32x128xf32>
    %27 = arith.addf %26, %25 : vector<32x128xf32>
    %28 = arith.divf %26, %27 : vector<32x128xf32>
    %29 = vector.extract_strided_slice %22 {offsets = [0, 128], sizes = [32, 64], strides = [1, 1]} : vector<32x256xf32> to vector<32x64xf32>
    %30 = arith.negf %29 : vector<32x64xf32>
    %31 = math.exp %30 : vector<32x64xf32>
    %cst_19 = arith.constant 1.000000e+00 : f32
    %32 = vector.broadcast %cst_19 : f32 to vector<32x64xf32>
    %33 = arith.addf %32, %31 : vector<32x64xf32>
    %34 = arith.divf %32, %33 : vector<32x64xf32>
    %35 = vector.extract_strided_slice %22 {offsets = [0, 192], sizes = [32, 64], strides = [1, 1]} : vector<32x256xf32> to vector<32x64xf32>
    %36 = math.tanh %35 : vector<32x64xf32>
    %37 = vector.extract_strided_slice %28 {offsets = [0, 64], sizes = [32, 64], strides = [1, 1]} : vector<32x128xf32> to vector<32x64xf32>
    %38 = vector.extract_strided_slice %12 {offsets = [0, 64], sizes = [32, 64], strides = [1, 1]} : vector<32x128xf32> to vector<32x64xf32>
    %39 = arith.mulf %37, %38 : vector<32x64xf32>
    %40 = vector.extract_strided_slice %28 {offsets = [0, 0], sizes = [32, 64], strides = [1, 1]} : vector<32x128xf32> to vector<32x64xf32>
    %41 = arith.mulf %40, %36 : vector<32x64xf32>
    %42 = arith.addf %39, %41 : vector<32x64xf32>
    %43 = math.tanh %42 : vector<32x64xf32>
    %44 = arith.mulf %34, %43 : vector<32x64xf32>
    %c0_20 = arith.constant 0 : index
    %c0_21 = arith.constant 0 : index
    %c0_22 = arith.constant 0 : index
    %45 = vector.load %arg11[%c0_20, %c0_21, %c0_22] : memref<3x32x128xf32, #tpu.memory_space<vmem>>, vector<1x32x64xf32>
    %46 = vector.shape_cast %45 : vector<1x32x64xf32> to vector<32x64xf32>
    %47 = vector.shape_cast %44 : vector<32x64xf32> to vector<1x32x64xf32>
    tpu.vector_store %arg11[%c0_20, %c0_21, %c0_22], %47 {strides = array<i32>} : memref<3x32x128xf32, #tpu.memory_space<vmem>>, vector<1x32x64xf32>,
    %c0_23 = arith.constant 0 : index
    %c0_24 = arith.constant 0 : index
    %c64_25 = arith.constant 64 : index
    %48 = vector.load %arg11[%c0_23, %c0_24, %c64_25] : memref<3x32x128xf32, #tpu.memory_space<vmem>>, vector<1x32x64xf32>
    %49 = vector.shape_cast %48 : vector<1x32x64xf32> to vector<32x64xf32>
    %50 = vector.shape_cast %42 : vector<32x64xf32> to vector<1x32x64xf32>
    tpu.vector_store %arg11[%c0_23, %c0_24, %c64_25], %50 {strides = array<i32>} : memref<3x32x128xf32, #tpu.memory_space<vmem>>, vector<1x32x64xf32>,
    %c0_26 = arith.constant 0 : index
    %c0_27 = arith.constant 0 : index
    %51 = vector.load %arg10[%c0_26, %c0_27] : memref<32x128xf32, #tpu.memory_space<vmem>>, vector<32x64xf32>
    tpu.vector_store %arg10[%c0_26, %c0_27], %44 {strides = array<i32>} : memref<32x128xf32, #tpu.memory_space<vmem>>, vector<32x64xf32>,
    %c1 = arith.constant 1 : index
    %c0_28 = arith.constant 0 : index
    %c0_29 = arith.constant 0 : index
    %52 = vector.load %arg11[%c1, %c0_28, %c0_29] : memref<3x32x128xf32, #tpu.memory_space<vmem>>, vector<1x32x128xf32>
    %53 = vector.shape_cast %52 : vector<1x32x128xf32> to vector<32x128xf32>
    %54 = vector.extract_strided_slice %53 {offsets = [0, 0], sizes = [32, 64], strides = [1, 1]} : vector<32x128xf32> to vector<32x64xf32>
    %c0_30 = arith.constant 0 : index
    %c64_31 = arith.constant 64 : index
    %55 = vector.load %arg10[%c0_30, %c64_31] : memref<32x128xf32, #tpu.memory_space<vmem>>, vector<32x64xf32>
    tpu.vector_store %arg10[%c0_30, %c64_31], %54 {strides = array<i32>} : memref<32x128xf32, #tpu.memory_space<vmem>>, vector<32x64xf32>,
    %c0_32 = arith.constant 0 : index
    %c0_33 = arith.constant 0 : index
    %56 = vector.load %arg10[%c0_32, %c0_33] : memref<32x128xf32, #tpu.memory_space<vmem>>, vector<32x128xf32>
    %c1_34 = arith.constant 1 : index
    %c0_35 = arith.constant 0 : index
    %c0_36 = arith.constant 0 : index
    %57 = vector.load %arg3[%c1_34, %c0_35, %c0_36] : memref<3x128x256xf32, #tpu.memory_space<vmem>>, vector<1x128x256xf32>
    %58 = vector.shape_cast %57 : vector<1x128x256xf32> to vector<128x256xf32>
    %cst_37 = arith.constant dense<0.000000e+00> : vector<32x256xf32>
    %59 = tpu.matmul %56, %58, %cst_37 {dimension_numbers = #tpu.dot_dimension_numbers<[1], [0], [0], [1], [0, 0, 1, 1], [], []>} : vector<32x128xf32>, vector<128x256xf32>, vector<32x256xf32> -> vector<32x256xf32>
    %c1_38 = arith.constant 1 : index
    %c0_39 = arith.constant 0 : index
    %c0_40 = arith.constant 0 : index
    %60 = vector.load %arg4[%c1_38, %c0_39, %c0_40] : memref<3x1x256xf32, #tpu.memory_space<vmem>>, vector<1x1x256xf32>
    %61 = vector.shape_cast %60 : vector<1x1x256xf32> to vector<1x256xf32>
    %62 = vector.broadcast %61 : vector<1x256xf32> to vector<32x256xf32>
    %63 = arith.addf %59, %62 : vector<32x256xf32>
    %64 = vector.extract_strided_slice %63 {offsets = [0, 0], sizes = [32, 128], strides = [1, 1]} : vector<32x256xf32> to vector<32x128xf32>
    %65 = arith.negf %64 : vector<32x128xf32>
    %66 = math.exp %65 : vector<32x128xf32>
    %cst_41 = arith.constant 1.000000e+00 : f32
    %67 = vector.broadcast %cst_41 : f32 to vector<32x128xf32>
    %68 = arith.addf %67, %66 : vector<32x128xf32>
    %69 = arith.divf %67, %68 : vector<32x128xf32>
    %70 = vector.extract_strided_slice %63 {offsets = [0, 128], sizes = [32, 64], strides = [1, 1]} : vector<32x256xf32> to vector<32x64xf32>
    %71 = arith.negf %70 : vector<32x64xf32>
    %72 = math.exp %71 : vector<32x64xf32>
    %cst_42 = arith.constant 1.000000e+00 : f32
    %73 = vector.broadcast %cst_42 : f32 to vector<32x64xf32>
    %74 = arith.addf %73, %72 : vector<32x64xf32>
    %75 = arith.divf %73, %74 : vector<32x64xf32>
    %76 = vector.extract_strided_slice %63 {offsets = [0, 192], sizes = [32, 64], strides = [1, 1]} : vector<32x256xf32> to vector<32x64xf32>
    %77 = math.tanh %76 : vector<32x64xf32>
    %78 = vector.extract_strided_slice %69 {offsets = [0, 64], sizes = [32, 64], strides = [1, 1]} : vector<32x128xf32> to vector<32x64xf32>
    %79 = vector.extract_strided_slice %53 {offsets = [0, 64], sizes = [32, 64], strides = [1, 1]} : vector<32x128xf32> to vector<32x64xf32>
    %80 = arith.mulf %78, %79 : vector<32x64xf32>
    %81 = vector.extract_strided_slice %69 {offsets = [0, 0], sizes = [32, 64], strides = [1, 1]} : vector<32x128xf32> to vector<32x64xf32>
    %82 = arith.mulf %81, %77 : vector<32x64xf32>
    %83 = arith.addf %80, %82 : vector<32x64xf32>
    %84 = math.tanh %83 : vector<32x64xf32>
    %85 = arith.mulf %75, %84 : vector<32x64xf32>
    %c1_43 = arith.constant 1 : index
    %c0_44 = arith.constant 0 : index
    %c0_45 = arith.constant 0 : index
    %86 = vector.load %arg11[%c1_43, %c0_44, %c0_45] : memref<3x32x128xf32, #tpu.memory_space<vmem>>, vector<1x32x64xf32>
    %87 = vector.shape_cast %86 : vector<1x32x64xf32> to vector<32x64xf32>
    %88 = vector.shape_cast %85 : vector<32x64xf32> to vector<1x32x64xf32>
    tpu.vector_store %arg11[%c1_43, %c0_44, %c0_45], %88 {strides = array<i32>} : memref<3x32x128xf32, #tpu.memory_space<vmem>>, vector<1x32x64xf32>,
    %c1_46 = arith.constant 1 : index
    %c0_47 = arith.constant 0 : index
    %c64_48 = arith.constant 64 : index
    %89 = vector.load %arg11[%c1_46, %c0_47, %c64_48] : memref<3x32x128xf32, #tpu.memory_space<vmem>>, vector<1x32x64xf32>
    %90 = vector.shape_cast %89 : vector<1x32x64xf32> to vector<32x64xf32>
    %91 = vector.shape_cast %83 : vector<32x64xf32> to vector<1x32x64xf32>
    tpu.vector_store %arg11[%c1_46, %c0_47, %c64_48], %91 {strides = array<i32>} : memref<3x32x128xf32, #tpu.memory_space<vmem>>, vector<1x32x64xf32>,
    %c0_49 = arith.constant 0 : index
    %c0_50 = arith.constant 0 : index
    %92 = vector.load %arg10[%c0_49, %c0_50] : memref<32x128xf32, #tpu.memory_space<vmem>>, vector<32x64xf32>
    tpu.vector_store %arg10[%c0_49, %c0_50], %85 {strides = array<i32>} : memref<32x128xf32, #tpu.memory_space<vmem>>, vector<32x64xf32>,
    %c2 = arith.constant 2 : index
    %c0_51 = arith.constant 0 : index
    %c0_52 = arith.constant 0 : index
    %93 = vector.load %arg11[%c2, %c0_51, %c0_52] : memref<3x32x128xf32, #tpu.memory_space<vmem>>, vector<1x32x128xf32>
    %94 = vector.shape_cast %93 : vector<1x32x128xf32> to vector<32x128xf32>
    %95 = vector.extract_strided_slice %94 {offsets = [0, 0], sizes = [32, 64], strides = [1, 1]} : vector<32x128xf32> to vector<32x64xf32>
    %c0_53 = arith.constant 0 : index
    %c64_54 = arith.constant 64 : index
    %96 = vector.load %arg10[%c0_53, %c64_54] : memref<32x128xf32, #tpu.memory_space<vmem>>, vector<32x64xf32>
    tpu.vector_store %arg10[%c0_53, %c64_54], %95 {strides = array<i32>} : memref<32x128xf32, #tpu.memory_space<vmem>>, vector<32x64xf32>,
    %c0_55 = arith.constant 0 : index
    %c0_56 = arith.constant 0 : index
    %97 = vector.load %arg10[%c0_55, %c0_56] : memref<32x128xf32, #tpu.memory_space<vmem>>, vector<32x128xf32>
    %c2_57 = arith.constant 2 : index
    %c0_58 = arith.constant 0 : index
    %c0_59 = arith.constant 0 : index
    %98 = vector.load %arg3[%c2_57, %c0_58, %c0_59] : memref<3x128x256xf32, #tpu.memory_space<vmem>>, vector<1x128x256xf32>
    %99 = vector.shape_cast %98 : vector<1x128x256xf32> to vector<128x256xf32>
    %cst_60 = arith.constant dense<0.000000e+00> : vector<32x256xf32>
    %100 = tpu.matmul %97, %99, %cst_60 {dimension_numbers = #tpu.dot_dimension_numbers<[1], [0], [0], [1], [0, 0, 1, 1], [], []>} : vector<32x128xf32>, vector<128x256xf32>, vector<32x256xf32> -> vector<32x256xf32>
    %c2_61 = arith.constant 2 : index
    %c0_62 = arith.constant 0 : index
    %c0_63 = arith.constant 0 : index
    %101 = vector.load %arg4[%c2_61, %c0_62, %c0_63] : memref<3x1x256xf32, #tpu.memory_space<vmem>>, vector<1x1x256xf32>
    %102 = vector.shape_cast %101 : vector<1x1x256xf32> to vector<1x256xf32>
    %103 = vector.broadcast %102 : vector<1x256xf32> to vector<32x256xf32>
    %104 = arith.addf %100, %103 : vector<32x256xf32>
    %105 = vector.extract_strided_slice %104 {offsets = [0, 0], sizes = [32, 128], strides = [1, 1]} : vector<32x256xf32> to vector<32x128xf32>
    %106 = arith.negf %105 : vector<32x128xf32>
    %107 = math.exp %106 : vector<32x128xf32>
    %cst_64 = arith.constant 1.000000e+00 : f32
    %108 = vector.broadcast %cst_64 : f32 to vector<32x128xf32>
    %109 = arith.addf %108, %107 : vector<32x128xf32>
    %110 = arith.divf %108, %109 : vector<32x128xf32>
    %111 = vector.extract_strided_slice %104 {offsets = [0, 128], sizes = [32, 64], strides = [1, 1]} : vector<32x256xf32> to vector<32x64xf32>
    %112 = arith.negf %111 : vector<32x64xf32>
    %113 = math.exp %112 : vector<32x64xf32>
    %cst_65 = arith.constant 1.000000e+00 : f32
    %114 = vector.broadcast %cst_65 : f32 to vector<32x64xf32>
    %115 = arith.addf %114, %113 : vector<32x64xf32>
    %116 = arith.divf %114, %115 : vector<32x64xf32>
    %117 = vector.extract_strided_slice %104 {offsets = [0, 192], sizes = [32, 64], strides = [1, 1]} : vector<32x256xf32> to vector<32x64xf32>
    %118 = math.tanh %117 : vector<32x64xf32>
    %119 = vector.extract_strided_slice %110 {offsets = [0, 64], sizes = [32, 64], strides = [1, 1]} : vector<32x128xf32> to vector<32x64xf32>
    %120 = vector.extract_strided_slice %94 {offsets = [0, 64], sizes = [32, 64], strides = [1, 1]} : vector<32x128xf32> to vector<32x64xf32>
    %121 = arith.mulf %119, %120 : vector<32x64xf32>
    %122 = vector.extract_strided_slice %110 {offsets = [0, 0], sizes = [32, 64], strides = [1, 1]} : vector<32x128xf32> to vector<32x64xf32>
    %123 = arith.mulf %122, %118 : vector<32x64xf32>
    %124 = arith.addf %121, %123 : vector<32x64xf32>
    %125 = math.tanh %124 : vector<32x64xf32>
    %126 = arith.mulf %116, %125 : vector<32x64xf32>
    %c2_66 = arith.constant 2 : index
    %c0_67 = arith.constant 0 : index
    %c0_68 = arith.constant 0 : index
    %127 = vector.load %arg11[%c2_66, %c0_67, %c0_68] : memref<3x32x128xf32, #tpu.memory_space<vmem>>, vector<1x32x64xf32>
    %128 = vector.shape_cast %127 : vector<1x32x64xf32> to vector<32x64xf32>
    %129 = vector.shape_cast %126 : vector<32x64xf32> to vector<1x32x64xf32>
    tpu.vector_store %arg11[%c2_66, %c0_67, %c0_68], %129 {strides = array<i32>} : memref<3x32x128xf32, #tpu.memory_space<vmem>>, vector<1x32x64xf32>,
    %c2_69 = arith.constant 2 : index
    %c0_70 = arith.constant 0 : index
    %c64_71 = arith.constant 64 : index
    %130 = vector.load %arg11[%c2_69, %c0_70, %c64_71] : memref<3x32x128xf32, #tpu.memory_space<vmem>>, vector<1x32x64xf32>
    %131 = vector.shape_cast %130 : vector<1x32x64xf32> to vector<32x64xf32>
    %132 = vector.shape_cast %124 : vector<32x64xf32> to vector<1x32x64xf32>
    tpu.vector_store %arg11[%c2_69, %c0_70, %c64_71], %132 {strides = array<i32>} : memref<3x32x128xf32, #tpu.memory_space<vmem>>, vector<1x32x64xf32>,
    %c0_72 = arith.constant 0 : index
    %c0_73 = arith.constant 0 : index
    %133 = vector.load %arg5[%c0_72, %c0_73] : memref<64x128xf32, #tpu.memory_space<vmem>>, vector<64x128xf32>
    %cst_74 = arith.constant dense<0.000000e+00> : vector<32x128xf32>
    %134 = tpu.matmul %126, %133, %cst_74 {dimension_numbers = #tpu.dot_dimension_numbers<[1], [0], [0], [1], [0, 0, 1, 1], [], []>} : vector<32x64xf32>, vector<64x128xf32>, vector<32x128xf32> -> vector<32x128xf32>
    %c0_75 = arith.constant 0 : index
    %c0_76 = arith.constant 0 : index
    %135 = vector.load %arg6[%c0_75, %c0_76] : memref<1x128xf32, #tpu.memory_space<vmem>>, vector<1x128xf32>
    %136 = vector.broadcast %135 : vector<1x128xf32> to vector<32x128xf32>
    %137 = arith.addf %134, %136 : vector<32x128xf32>
    %c0_77 = arith.constant 0 : index
    %c0_78 = arith.constant 0 : index
    %c0_79 = arith.constant 0 : index
    %138 = vector.load %arg8[%c0_77, %c0_78, %c0_79] : memref<1x32x128xf32, #tpu.memory_space<vmem>>, vector<1x32x128xf32>
    %139 = vector.shape_cast %138 : vector<1x32x128xf32> to vector<32x128xf32>
    %140 = vector.shape_cast %137 : vector<32x128xf32> to vector<1x32x128xf32>
    tpu.vector_store %arg8[%c0_77, %c0_78, %c0_79], %140 {strides = array<i32>} : memref<1x32x128xf32, #tpu.memory_space<vmem>>, vector<1x32x128xf32>,
    %c3_i32 = arith.constant 3 : i32
    %141 = arith.cmpi eq, %arg1, %c3_i32 : i32
    %142 = arith.extui %141 : i1 to i32
    %c0_i32_80 = arith.constant 0 : i32
    %143 = arith.cmpi ne, %142, %c0_i32_80 : i32
    scf.if %143 {
      %c0_81 = arith.constant 0 : index
      %c0_82 = arith.constant 0 : index
      %c0_83 = arith.constant 0 : index
      %144 = vector.load %arg11[%c0_81, %c0_82, %c0_83] : memref<3x32x128xf32, #tpu.memory_space<vmem>>, vector<3x32x128xf32>
      %c0_84 = arith.constant 0 : index
      %c0_85 = arith.constant 0 : index
      %c0_86 = arith.constant 0 : index
      %145 = vector.load %arg9[%c0_84, %c0_85, %c0_86] : memref<3x32x128xf32, #tpu.memory_space<vmem>>, vector<3x32x128xf32>
      tpu.vector_store %arg9[%c0_84, %c0_85, %c0_86], %144 {strides = array<i32>} : memref<3x32x128xf32, #tpu.memory_space<vmem>>, vector<3x32x128xf32>,
    } else {
    }
    return
  }
  func.func @transform_0(%arg0: i32, %arg1: i32) -> (i32, i32, i32, i32) {
    %c0_i32 = arith.constant 0 : i32
    %c0_i32_0 = arith.constant 0 : i32
    %c0_i32_1 = arith.constant 0 : i32
    return %arg1, %arg0, %c0_i32, %c0_i32_0 : i32, i32, i32, i32
  }
  func.func @transform_1(%arg0: i32, %arg1: i32) -> (i32, i32, i32) {
    %c0_i32 = arith.constant 0 : i32
    %c0_i32_0 = arith.constant 0 : i32
    %c0_i32_1 = arith.constant 0 : i32
    %c0_i32_2 = arith.constant 0 : i32
    return %c0_i32, %c0_i32_0, %c0_i32_1 : i32, i32, i32
  }
  func.func @transform_2(%arg0: i32, %arg1: i32) -> (i32, i32, i32) {
    %c0_i32 = arith.constant 0 : i32
    %c0_i32_0 = arith.constant 0 : i32
    %c0_i32_1 = arith.constant 0 : i32
    %c0_i32_2 = arith.constant 0 : i32
    return %c0_i32, %c0_i32_0, %c0_i32_1 : i32, i32, i32
  }
  func.func @transform_3(%arg0: i32, %arg1: i32) -> (i32, i32) {
    %c0_i32 = arith.constant 0 : i32
    %c0_i32_0 = arith.constant 0 : i32
    %c0_i32_1 = arith.constant 0 : i32
    return %c0_i32, %c0_i32_0 : i32, i32
  }
  func.func @transform_4(%arg0: i32, %arg1: i32) -> (i32, i32) {
    %c0_i32 = arith.constant 0 : i32
    %c0_i32_0 = arith.constant 0 : i32
    %c0_i32_1 = arith.constant 0 : i32
    return %c0_i32, %c0_i32_0 : i32, i32
  }
  func.func @transform_5(%arg0: i32, %arg1: i32) -> (i32, i32, i32) {
    %c0_i32 = arith.constant 0 : i32
    %c0_i32_0 = arith.constant 0 : i32
    %c0_i32_1 = arith.constant 0 : i32
    return %c0_i32, %arg0, %c0_i32_0 : i32, i32, i32
  }
  func.func @transform_6(%arg0: i32, %arg1: i32) -> (i32, i32, i32) {
    %c0_i32 = arith.constant 0 : i32
    %c0_i32_0 = arith.constant 0 : i32
    return %arg1, %arg0, %c0_i32 : i32, i32, i32
  }
  func.func @transform_7(%arg0: i32, %arg1: i32) -> (i32, i32, i32) {
    %c0_i32 = arith.constant 0 : i32
    %c0_i32_0 = arith.constant 0 : i32
    %c0_i32_1 = arith.constant 0 : i32
    return %c0_i32, %arg0, %c0_i32_0 : i32, i32, i32
  }
}

</mosaic_0001>

<bundles_post_ra>
// kernel: decoder_forward.1
= control target key start
LH: loop header
LB: loop body
LE: loop exit
PB: predicated region body
PF: predicated region fallthrough
CT: control target
= control target key end

     0   :  { %s3055_s0 = inlined_call_operand.vmem [shape: s32[4,2,32,1], index: 0, kind: input, shape index: {}]   ;;  %s3056_s1 = inlined_call_operand.vmem [shape: f32[3,128,256], index: 1, kind: input, shape index: {}]   ;;  %s3057_s2 = inlined_call_operand.vmem [shape: f32[3,1,256], index: 2, kind: input, shape index: {}]   ;;  %s3058_s3 = inlined_call_operand.vmem [shape: f32[64,128], index: 3, kind: input, shape index: {}]   ;;  %s3059_s4 = inlined_call_operand.vmem [shape: f32[1,128], index: 4, kind: input, shape index: {}]   ;;  %s3060_s5 = inlined_call_operand.vmem [shape: f32[3,64,128], index: 5, kind: input, shape index: {}, may-alias: {5,7}]   ;;  %s3061_s6 = inlined_call_operand.vmem [shape: f32[4,64,128], index: 6, kind: output, shape index: {0}]   ;;  %s3062_s7 = inlined_call_operand.vmem [shape: f32[3,64,128], index: 7, kind: output, shape index: {1}, may-alias: {5,7}]  }
   0x1   :  { %3065 = sst [smem:[#allocation9_spill]] %s3060_s5 }
   0x2   :  { %s2310_s24 = smov 0   ;;  %s2312_s25 = smov 0  }
   0x3   :  { %s2314_s26 = smov 0   ;;  %s2316_s27 = smov 0  }
   0x4   :  { %s2318_s28 = smov 0   ;;  %s2320_s29 = smov 0  }
   0x5   :  { %s2322_s30 = smov 0  }
   0x6 LB: > { %3066 = sst [smem:[#allocation6_spill]] %s2261_s29  ;;  %s27_s8 = sadd.s32 1, %s2257_s28  ;;  %s2265_s30 = sphi %s2322_s30, %s18_s30   ;;  %s2261_s29 = sphi %s2320_s29, %s3073_s29   ;;  %s2257_s28 = sphi %s2318_s28, %s3077_s28   ;;  %s2253_s27 = sphi %s2316_s27, %s3071_s27   ;;  %s2249_s26 = sphi %s2314_s26, %s3076_s26   ;;  %s2245_s25 = sphi %s2312_s25, %s3075_s25   ;;  %s2241_s24 = sphi %s2310_s24, %s3074_s24  }
   0x7   : > { %p28_p0 = scmp.ge.s32.totalorder %s27_s8, 4  ;;  %s30_s9 = sadd.s32 1, %s2261_s29 }
   0x8   : > { %s1738_s10 = sadd.s32 4294967295, %s2265_s30   ;;  %p156_p1 = scmp.ne.s32.totalorder %s2245_s25, %s2241_s24 }
   0x9   : > { %s3079_s8 = smov (%p28_p0, %s27_s8), 0  ;;  %s3081_s9 = smov (!%p28_p0, %s30_s9), %s2261_s29 }
   0xa   : > { %3067 = sst [smem:[#allocation7_spill]] %s3079_s8  ;;  %p157_p2 = scmp.eq.s32.totalorder %s2265_s30, 0 }
   0xb   : > { %p214_p3 = scmp.eq.s32.totalorder %s1738_s10, 7  ;;  %p32_p4 = scmp.ge.s32.totalorder %s3081_s9, 2 }
   0xc   : > { %p158_p5 = por %p157_p2, %p156_p1  ;;  %s149_s13 = sadd.s32 1, %s2245_s25 }
   0xd   : > { %p2354_p6 = por %p214_p3, %p156_p1  ;;  %s3083_s9 = smov (%p32_p4, %s3081_s9), 0 }
   0xe   : > { %3069 = sst [smem:[#allocation8_spill]] %s3083_s9  ;;  %s146_s12 = ssub.s32 %s2261_s29, %s3083_s9 }
   0xf   : > { %p147_p7 = scmp.eq.s32.totalorder %s146_s12, 0  ;;  %p1741_p8 = scmp.ge.s32.totalorder %s2265_s30, 8 }
  0x11   : > { %s2364_s14 = scalar_select %p147_p7, %s2245_s25, %s149_s13  }
  0x12   : > { %248 = sbr.rel (%p1741_p8) target bundleno = 42 (0x2a), region = 32 }
  0x19   : > { %263 = sbr.rel (!%p158_p5) target bundleno = 42 (0x2a), region = 40  ;;  %s265_s15 = sand.u32 (%p158_p5), 1, %s2245_s25  }
  0x1a   : > { %s1856_s16 = sshll.u32 (%p158_p5), %s2261_s29, 5  ;;  %s2004_s17 = smul.u32 (%p158_p5), 96, %s265_s15 }
  0x1b   : > { %s3070_s5 = sld [smem:[#allocation9_spill]] (%p158_p5) }
  0x1c   : > { %s267_s21 = scalar_lea.vmem (%p158_p5), [#allocation4], %s2004_s17 }
  0x21   : > { %s270_s20 = scalar_lea.vmem %s3070_s5, %s1856_s16 }
  0x22   : > { %v320_v0 = vld [vmem:[%s270_s20] sm:$0xff]  ;;  %v322_v1 = vld [vmem:[%s270_s20 + $0x8] sm:$0xff]  ;;  %v324_v2 = vld [vmem:[%s270_s20 + $0x10] sm:$0xff] }
  0x23   : > { %v326_v3 = vld [vmem:[%s270_s20 + $0x18] sm:$0xff]  ;;  %v328_v4 = vld [vmem:[%s270_s20 + $0x40] sm:$0xff]  ;;  %v330_v5 = vld [vmem:[%s270_s20 + $0x48] sm:$0xff]  ;;  %321 = vst [vmem:[%s267_s21] sm:$0xff] %v320_v0 }
  0x24   : > { %323 = vst [vmem:[%s267_s21 + $0x8] sm:$0xff] %v322_v1  ;;  %325 = vst [vmem:[%s267_s21 + $0x10] sm:$0xff] %v324_v2  ;;  %v332_v6 = vld [vmem:[%s270_s20 + $0x50] sm:$0xff]  ;;  %v334_v7 = vld [vmem:[%s270_s20 + $0x58] sm:$0xff] }
  0x25   : > { %327 = vst [vmem:[%s267_s21 + $0x18] sm:$0xff] %v326_v3  ;;  %329 = vst [vmem:[%s267_s21 + $0x20] sm:$0xff] %v328_v4  ;;  %v336_v8 = vld [vmem:[%s270_s20 + $0x80] sm:$0xff]  ;;  %v338_v9 = vld [vmem:[%s270_s20 + $0x88] sm:$0xff] }
  0x26   : > { %331 = vst [vmem:[%s267_s21 + $0x28] sm:$0xff] %v330_v5  ;;  %333 = vst [vmem:[%s267_s21 + $0x30] sm:$0xff] %v332_v6  ;;  %v340_v10 = vld [vmem:[%s270_s20 + $0x90] sm:$0xff]  ;;  %v342_v11 = vld [vmem:[%s270_s20 + $0x98] sm:$0xff] }
  0x27   : > { %335 = vst [vmem:[%s267_s21 + $0x38] sm:$0xff] %v334_v7  ;;  %337 = vst [vmem:[%s267_s21 + $0x40] sm:$0xff] %v336_v8 }
  0x28   : > { %339 = vst [vmem:[%s267_s21 + $0x48] sm:$0xff] %v338_v9  ;;  %341 = vst [vmem:[%s267_s21 + $0x50] sm:$0xff] %v340_v10 }
  0x29   : > { %343 = vst [vmem:[%s267_s21 + $0x58] sm:$0xff] %v342_v11 }
  0x2a PF: > { %p1744_p9 = scmp.ge.s32.totalorder %s2265_s30, 1  ;;  %p348_p10 = scmp.lt.s32.totalorder %s2265_s30, 9 }
  0x2c   : > { %p349_p11 = pnand %p1744_p9, %p348_p10 }
  0x2d   : > { %s355_s22 = sand.u32 (!%p349_p11), 1, %s2241_s24   ;;  %p403_p12 = scmp.lt.s32.totalorder (!%p349_p11), %s2249_s26, 3 }
  0x2e   : > { %352 = sbr.rel (%p349_p11) target bundleno = 2227 (0x8b3), region = 78  ;;  %p405_p13 = scmp.lt.s32.totalorder (!%p349_p11), %s2253_s27, 1 }
  0x2f   : > { %s2005_s23 = smul.u32 (!%p349_p11), 96, %s355_s22  ;;  %s1748_s15 = sshll.u32 (!%p349_p11), %s2253_s27, 2 }
  0x30   : > { %p416_p0 = scmp.lt.s32.totalorder (!%p349_p11), %s1748_s15, 7  ;;  %p1751_p1 = scmp.ne.s32.totalorder (!%p349_p11), %s2249_s26, 0 }
  0x31   : > { %s357_s29 = scalar_lea.vmem (!%p349_p11), [#allocation4], %s2005_s23 }
  0x35   : > { %s404_s10 = scalar_select %p403_p12, %s2249_s26, 3 }
  0x36   : > { %s406_s12 = scalar_select %p405_p13, %s2253_s27, 1 }
  0x37   : > { %s1746_s13 = sshll.u32 %s404_s10, 3  ;;  %s3085_s15 = smov (!%p416_p0, %s1748_s15), 7  ;;  %v428_v12 = vld [vmem:[%s357_s29] sm:$0xff] (!%p1751_p1)  ;;  %v429_v13 = vld [vmem:[%s357_s29 + $0x8] sm:$0xff] (!%p1751_p1)  ;;  %v430_v14 = vld [vmem:[%s357_s29 + $0x10] sm:$0xff] (!%p1751_p1) }
  0x38   : > { %s1745_s16 = sshll.u32 %s406_s12, 2  ;;  %s419_s5 = sadd.s32 %s1746_s13, %s3085_s15  ;;  %440 = vst [vmem:[#allocation3] sm:$0xff] (!%p1751_p1), %v428_v12  ;;  %441 = vst [vmem:[#allocation3 + $0x8] sm:$0xff] (!%p1751_p1), %v429_v13  ;;  %v431_v15 = vld [vmem:[%s357_s29 + $0x18] sm:$0xff] (!%p1751_p1)  ;;  %v432_v16 = vld [vmem:[%s357_s29 + $0x20] sm:$0xff] (!%p1751_p1) }
  0x39   : > { %s409_s17 = sadd.s32 %s1746_s13, %s1745_s16  ;;  %s1750_s9 = sshll.u32 %s419_s5, 3  ;;  %442 = vst [vmem:[#allocation3 + $0x10] sm:$0xff] (!%p1751_p1), %v430_v14  ;;  %v433_v17 = vld [vmem:[%s357_s29 + $0x28] sm:$0xff] (!%p1751_p1)  ;;  %443 = vst [vmem:[#allocation3 + $0x18] sm:$0xff] (!%p1751_p1), %v431_v15  ;;  %v434_v18 = vld [vmem:[%s357_s29 + $0x30] sm:$0xff] (!%p1751_p1) }
  0x3a   : > { %s1747_s18 = sshll.u32 %s409_s17, 3  ;;  %s2388_s22 = scalar_lea.vmem %s3061_s6, %s1750_s9  ;;  %444 = vst [vmem:[#allocation3 + $0x20] sm:$0xff] (!%p1751_p1), %v432_v16  ;;  %445 = vst [vmem:[#allocation3 + $0x28] sm:$0xff] (!%p1751_p1), %v433_v17  ;;  %v435_v19 = vld [vmem:[%s357_s29 + $0x38] sm:$0xff] (!%p1751_p1)  ;;  %v436_v20 = vld [vmem:[%s357_s29 + $0x40] sm:$0xff] (!%p1751_p1) }
  0x3b   : > { %s2383_s21 = scalar_lea.vmem %s3055_s0, %s1747_s18  ;;  %s2390_s10 = scalar_lea.vmem [#allocation5], %s2005_s23  ;;  %446 = vst [vmem:[#allocation3 + $0x30] sm:$0xff] (!%p1751_p1), %v434_v18  ;;  %447 = vst [vmem:[#allocation3 + $0x38] sm:$0xff] (!%p1751_p1), %v435_v19  ;;  %v437_v21 = vld [vmem:[%s357_s29 + $0x48] sm:$0xff] (!%p1751_p1)  ;;  %v438_v22 = vld [vmem:[%s357_s29 + $0x50] sm:$0xff] (!%p1751_p1) }
  0x3c   : > { %427 = sbr.rel (%p1751_p1) target bundleno = 67 (0x43), region = 86  ;;  %448 = vst [vmem:[#allocation3 + $0x40] sm:$0xff] (!%p1751_p1), %v436_v20  ;;  %v439_v23 = vld [vmem:[%s357_s29 + $0x58] sm:$0xff] (!%p1751_p1)  ;;  %449 = vst [vmem:[#allocation3 + $0x48] sm:$0xff] (!%p1751_p1), %v437_v21 }
  0x3d   : > { %450 = vst [vmem:[#allocation3 + $0x50] sm:$0xff] (!%p1751_p1), %v438_v22  ;;  %451 = vst [vmem:[#allocation3 + $0x58] sm:$0xff] (!%p1751_p1), %v439_v23 }
  0x43 PF: > { %v454_v24 = vld [vmem:[%s2383_s21 + $0x10] sm:$0xff]  ;;  %v452_v25 = vld [vmem:[%s2383_s21] sm:$0xff]  ;;  %v2267_v26 = vmov 0   ;;  %v453_v27 = vld [vmem:[%s2383_s21 + $0x8] sm:$0xff]  ;;  %v2268_v33 = vmov 0.0   ;;  %s2269_s29 = smov 64   ;;  %v456_v18 = vlaneseq }
  0x44   : > { %2066 = vset.pattern.permute.xlu1 %v2267_v26  ;;  %2065 = vset.pattern.permute.xlu0 %v2267_v26  ;;  %v2396_v28 = vld [vmem:[#allocation3] sm:$0xff]  ;;  %v517_v29 = vld [vmem:[%s3056_s1 + $0x8] sm:$0xff]  ;;  %v519_v30 = vld [vmem:[%s3056_s1 + $0x18] sm:$0xff]  ;;  %vm482_vm0 = vcmask 523264   ;;  %vm507_vm3 = vcmask 1048064   ;;  %p1851_p2 = scmp.ne.s32.totalorder %s2249_s26, 3 }
  0x45   : > { %465 = vperm.xlu1 %2066, %v454_v24   ;;  %459 = vperm.xlu0 %2065, %v452_v25   ;;  %v516_v31 = vld [vmem:[%s3056_s1] sm:$0xff]  ;;  %v518_v32 = vld [vmem:[%s3056_s1 + $0x10] sm:$0xff]  ;;  %v1892_v34 = vpack.c.bf16 %v519_v30, %v517_v29  ;;  %v521_v36 = vld [vmem:[%s3056_s1 + $0x28] sm:$0xff]  ;;  %v457_v19 = vand.u32 127, %v456_v18 }
  0x46   : > { %624 = vmatprep.mubr.f32.mxu0 %v2268_v33  ;;  %920 = vmatprep.mubr.f32.mxu1 %v2268_v33  ;;  %v1894_v35 = vpack.c.bf16 %v518_v32, %v516_v31  ;;  %v523_v37 = vld [vmem:[%s3056_s1 + $0x38] sm:$0xff]  ;;  %v520_v39 = vld [vmem:[%s3056_s1 + $0x20] sm:$0xff]  ;;  %v522_v40 = vld [vmem:[%s3056_s1 + $0x30] sm:$0xff] }
  0x47   : > { %v1896_v38 = vpack.c.bf16 %v523_v37, %v521_v36  ;;  %v525_v41 = vld [vmem:[%s3056_s1 + $0x48] sm:$0xff]  ;;  %v527_v42 = vld [vmem:[%s3056_s1 + $0x58] sm:$0xff]  ;;  %1893 = vmatprep.subr.bf16.mxu0 %v1892_v34  ;;  %v1898_v45 = vpack.c.bf16 %v522_v40, %v520_v39  ;;  %v524_v47 = vld [vmem:[%s3056_s1 + $0x40] sm:$0xff] }
  0x48   : > { %v455_v43 = vld [vmem:[%s2383_s21 + $0x18] sm:$0xff]  ;;  %v2433_v44 = vld [vmem:[#allocation3 + $0x8] sm:$0xff]  ;;  %1895 = vmatpush1.bf16.msra.mxu0 %v1894_v35  ;;  %v1900_v46 = vpack.c.bf16 %v527_v42, %v525_v41  ;;  %v526_v48 = vld [vmem:[%s3056_s1 + $0x50] sm:$0xff] }
  0x49   : > { %462 = vperm.xlu0 %2065, %v453_v27   ;;  %495 = vrot.lane.b32.xlu1 %v2396_v28, %s2269_s29  ;;  %v529_v49 = vld [vmem:[%s3056_s1 + $0x68] sm:$0xff]  ;;  %v531_v50 = vld [vmem:[%s3056_s1 + $0x78] sm:$0xff]  ;;  %v2449_v51 = vld [vmem:[#allocation3 + $0x10] sm:$0xff]  ;;  %v1902_v53 = vpack.c.bf16 %v526_v48, %v524_v47 }
  0x4a   : > { %1897 = vmatprep.subr.bf16.mxu0 %v1896_v38  ;;  %v2451_v52 = vld [vmem:[#allocation3 + $0x18] sm:$0xff]  ;;  %v1904_v54 = vpack.c.bf16 %v531_v50, %v529_v49  ;;  %v528_v55 = vld [vmem:[%s3056_s1 + $0x60] sm:$0xff]  ;;  %v530_v56 = vld [vmem:[%s3056_s1 + $0x70] sm:$0xff]  ;;  %v551_v38 = vshrl.u32 %v456_v18, 7 }
  0x4b   : > { %v533_v57 = vld [vmem:[%s3056_s1 + $0x88] sm:$0xff]  ;;  %v535_v58 = vld [vmem:[%s3056_s1 + $0x98] sm:$0xff]  ;;  %v1906_v59 = vpack.c.bf16 %v530_v56, %v528_v55  ;;  %v532_v61 = vld [vmem:[%s3056_s1 + $0x80] sm:$0xff] }
  0x4c   : > { %1899 = vmatpush1.bf16.msra.mxu0 %v1898_v45  ;;  %v1908_v60 = vpack.c.bf16 %v535_v58, %v533_v57  ;;  %v534_v62 = vld [vmem:[%s3056_s1 + $0x90] sm:$0xff]  ;;  %v537_v63 = vld [vmem:[%s3056_s1 + $0xa8] sm:$0xff]  ;;  %v539_v0 = vld [vmem:[%s3056_s1 + $0xb8] sm:$0xff]  ;;  %v2527_v39 = vsub.s32 1, %v551_v38 }
  0x4d   : > { %468 = vperm.xlu0 %2065, %v455_v43   ;;  %497 = vrot.lane.b32.xlu1 %v2433_v44, %s2269_s29  ;;  %v1910_v1 = vpack.c.bf16 %v534_v62, %v532_v61  ;;  %v1912_v2 = vpack.c.bf16 %v539_v0, %v537_v63  ;;  %v536_v3 = vld [vmem:[%s3056_s1 + $0xa0] sm:$0xff]  ;;  %v538_v4 = vld [vmem:[%s3056_s1 + $0xb0] sm:$0xff]  ;;  %v541_v5 = vld [vmem:[%s3056_s1 + $0xc8] sm:$0xff]  ;;  %v2549_v61 = vsub.s32 0, %v551_v38 }
  0x4e   : > { %1901 = vmatprep.subr.bf16.mxu0 %v1900_v46  ;;  %v543_v6 = vld [vmem:[%s3056_s1 + $0xd8] sm:$0xff]  ;;  %v1914_v7 = vpack.c.bf16 %v538_v4, %v536_v3  ;;  %v540_v9 = vld [vmem:[%s3056_s1 + $0xc0] sm:$0xff]  ;;  %v542_v10 = vld [vmem:[%s3056_s1 + $0xd0] sm:$0xff] }
  0x4f   : > { %v1916_v8 = vpack.c.bf16 %v543_v6, %v541_v5  ;;  %v545_v11 = vld [vmem:[%s3056_s1 + $0xe8] sm:$0xff]  ;;  %v547_v12 = vld [vmem:[%s3056_s1 + $0xf8] sm:$0xff]  ;;  %v1918_v13 = vpack.c.bf16 %v542_v10, %v540_v9  ;;  %v544_v15 = vld [vmem:[%s3056_s1 + $0xe0] sm:$0xff] }
  0x50   : > { %1903 = vmatpush1.bf16.msra.mxu0 %v1902_v53  ;;  %v1920_v14 = vpack.c.bf16 %v547_v12, %v545_v11  ;;  %v546_v16 = vld [vmem:[%s3056_s1 + $0xf0] sm:$0xff]  ;;  %v548_v40 = vld [vmem:[%s3057_s2] sm:$0x3] }
  0x51   : > { %499 = vrot.lane.b32.xlu0 %v2449_v51, %s2269_s29  ;;  %501 = vrot.lane.b32.xlu1 %v2451_v52, %s2269_s29  ;;  %v1922_v17 = vpack.c.bf16 %v546_v16, %v544_v15  ;;  %v557_v41 = vrot.slane %v548_v40, %v2527_v39  ;;  %v553_v62 = vrot.slane %v548_v40, %v2549_v61  ;;  %v1768_v38 = vld [vmem:[%s3056_s1 + $0x120] sm:$0xff]  ;;  %v1770_v40 = vld [vmem:[%s3056_s1 + $0x130] sm:$0xff] }
  0x52   : > { %1905 = vmatprep.subr.bf16.mxu0 %v1904_v54 }
  0x54   : > { %1907 = vmatpush1.bf16.msra.mxu0 %v1906_v59 }
  0x55   : > { %1909 = vmatprep.subr.bf16.mxu0 %v1908_v60 }
  0x58   : > { %1911 = vmatpush1.bf16.msra.mxu0 %v1910_v1 }
  0x59   : > { %1913 = vmatprep.subr.bf16.mxu0 %v1912_v2 }
  0x5c   : > { %1915 = vmatpush1.bf16.msra.mxu0 %v1914_v7 }
  0x5d   : > { %1917 = vmatprep.subr.bf16.mxu0 %v1916_v8 }
  0x60   : > { %1919 = vmatpush1.bf16.msra.mxu0 %v1918_v13 }
  0x61   : > { %1921 = vmatprep.subr.bf16.mxu0 %v1920_v14 }
  0x64   : > { %1923 = vmatpush1.bf16.msra.mxu0 %v1922_v17 }
  0xc4   : > { %v466_v20 = vpop.permute.xlu1 %465  ;;  %v460_v21 = vpop.permute.xlu0 %459 }
  0xc5   : > { %vm472_vm1 = vcmp.eq.s32.totalorder %v457_v19, %v466_v20  ;;  %vm470_vm2 = vcmp.eq.s32.totalorder %v457_v19, %v460_v21 }
  0xc6   : > { %v1754_v22 = vsel %vm472_vm1, 1.0, %v2268_v33  ;;  %v1752_v23 = vsel %vm470_vm2, 1.0, %v2268_v33 }
  0xc7   : > { %485 = vst.msk [vmem:[#allocation2 + $0x10] sm:$0xff] %vm482_vm0, %v1754_v22  ;;  %483 = vst.msk [vmem:[#allocation2] sm:$0xff] %vm482_vm0, %v1752_v23 }
  0xc8   : > { %v496_v24 = vpop.permute.xlu1 %495  ;;  %v463_v25 = vpop.permute.xlu0 %462 }
  0xc9   : > { %508 = vst.msk [vmem:[#allocation2] sm:$0xff] %vm507_vm3, %v496_v24  ;;  %vm471_vm4 = vcmp.eq.s32.totalorder %v457_v19, %v463_v25 }
  0xca   : > { %v1753_v26 = vsel %vm471_vm4, 1.0, %v2268_v33 }
  0xcb   : > { %484 = vst.msk [vmem:[#allocation2 + $0x8] sm:$0xff] %vm482_vm0, %v1753_v26 }
  0xcc   : > { %v498_v27 = vpop.permute.xlu1 %497  ;;  %v469_v29 = vpop.permute.xlu0 %468 }
  0xcd   : > { %509 = vst.msk [vmem:[#allocation2 + $0x8] sm:$0xff] %vm507_vm3, %v498_v27  ;;  %vm473_vm5 = vcmp.eq.s32.totalorder %v457_v19, %v469_v29  ;;  %v2568_v27 = vld [vmem:[#allocation3 + $0x20] sm:$0xff]  ;;  %v1765_v29 = vld [vmem:[%s3056_s1 + $0x108] sm:$0xff] }
  0xce   : > { %v1755_v30 = vsel %vm473_vm5, 1.0, %v2268_v33 }
  0xcf   : > { %486 = vst.msk [vmem:[#allocation2 + $0x18] sm:$0xff] %vm482_vm0, %v1755_v30  ;;  %v1767_v30 = vld [vmem:[%s3056_s1 + $0x118] sm:$0xff] }
  0xd0   : > { %v500_v31 = vpop.permute.xlu0 %499  ;;  %v512_v32 = vld [vmem:[#allocation2] sm:$0xff]  ;;  %v502_v34 = vpop.permute.xlu1 %501 }
  0xd1   : > { %510 = vst.msk [vmem:[#allocation2 + $0x10] sm:$0xff] %vm507_vm3, %v500_v31  ;;  %625 = vmatmul.mubr.f32.vlgmr.msra.gmra.mrb[0].mxu0 %v512_v32  ;;  %511 = vst.msk [vmem:[#allocation2 + $0x18] sm:$0xff] %vm507_vm3, %v502_v34  ;;  %v1924_v31 = vpack.c.bf16 %v1767_v30, %v1765_v29  ;;  %v1764_v32 = vld [vmem:[%s3056_s1 + $0x100] sm:$0xff]  ;;  %v1766_v34 = vld [vmem:[%s3056_s1 + $0x110] sm:$0xff] }
  0xd2   : > { %630 = vmatprep.mubr.f32.mxu0 %v2268_v33  ;;  %v1793_v29 = vld [vmem:[%s3056_s1 + $0x1e8] sm:$0xff]  ;;  %v1795_v30 = vld [vmem:[%s3056_s1 + $0x1f8] sm:$0xff] }
  0xd3   : > { %1925 = vmatprep.subr.bf16.mxu1 %v1924_v31 }
  0xd4   : > { %v513_v35 = vld [vmem:[#allocation2 + $0x8] sm:$0xff] }
  0xd5   : > { %631 = vmatmul.mubr.f32.gmra.mrb[2].mxu0 %v513_v35  ;;  %v1769_v35 = vld [vmem:[%s3056_s1 + $0x128] sm:$0xff] }
  0xd6   : > { %636 = vmatprep.mubr.f32.mxu0 %v2268_v33 }
  0xd8   : > { %v514_v36 = vld [vmem:[#allocation2 + $0x10] sm:$0xff]  ;;  %v515_v37 = vld [vmem:[#allocation2 + $0x18] sm:$0xff] }
  0xd9   : > { %637 = vmatmul.mubr.f32.gmra.mrb[4].mxu0 %v514_v36  ;;  %v1926_v36 = vpack.c.bf16 %v1766_v34, %v1764_v32  ;;  %v1952_v32 = vpack.c.bf16 %v1795_v30, %v1793_v29  ;;  %v1792_v34 = vld [vmem:[%s3056_s1 + $0x1e0] sm:$0xff] }
  0xda   : > { %642 = vmatprep.mubr.f32.mxu0 %v2268_v33 }
  0xdb   : > { %1927 = vmatpush1.bf16.msra.mxu1 %v1926_v36 }
  0xdd   : > { %643 = vmatmul.mubr.f32.gmra.mrb[6].mxu0 %v515_v37  ;;  %v1771_v37 = vld [vmem:[%s3056_s1 + $0x138] sm:$0xff] }
  0xde   : > { %1216 = vmatprep.mubr.f32.mxu0 %v2268_v33 }
 0x1a4   : > { %v626_v42 = vpop.f32.mrb[0].mxu0 }
 0x1a5   : > { %v628_v43 = vpop.f32.mrb[1].mxu0  ;;  %v627_v63 = vadd.f32 %v626_v42, %v553_v62  ;;  %v1773_v42 = vld [vmem:[%s3056_s1 + $0x148] sm:$0xff] }
 0x1a6   : > { %v2533_v45 = vadd.f32 %v628_v43, %v557_v41  ;;  %v1775_v43 = vld [vmem:[%s3056_s1 + $0x158] sm:$0xff] }
 0x1a7   : > { %v1756_v0 = vmul.f32 -1.442695, %v627_v63  ;;  %v1778_v63 = vld [vmem:[%s3056_s1 + $0x170] sm:$0xff] }
 0x1a8   : > { %2067 = vtanh.f32 %v2533_v45  ;;  %v632_v46 = vpop.f32.mrb[2].mxu0 }
 0x1a9   : > { %v634_v47 = vpop.f32.mrb[3].mxu0  ;;  %v633_v1 = vadd.f32 %v632_v46, %v553_v62  ;;  %v1930_v46 = vpack.c.bf16 %v1770_v40, %v1768_v38 }
 0x1aa   : > { %v2536_v48 = vadd.f32 %v634_v47, %v557_v41  ;;  %v2602_v47 = vld [vmem:[#allocation3 + $0x28] sm:$0xff] }
 0x1ab   : > { %v1757_v2 = vmul.f32 -1.442695, %v633_v1  ;;  %v1783_v1 = vld [vmem:[%s3056_s1 + $0x198] sm:$0xff] }
 0x1ac   : > { %2069 = vtanh.f32 %v2536_v48  ;;  %v638_v49 = vpop.f32.mrb[4].mxu0 }
 0x1ad   : > { %v640_v50 = vpop.f32.mrb[5].mxu0  ;;  %v639_v3 = vadd.f32 %v638_v49, %v553_v62  ;;  %v1932_v49 = vpack.c.bf16 %v1775_v43, %v1773_v42 }
 0x1ae   : > { %v2539_v53 = vadd.f32 %v640_v50, %v557_v41  ;;  %v1772_v50 = vld [vmem:[%s3056_s1 + $0x140] sm:$0xff] }
 0x1af   : > { %v1758_v4 = vmul.f32 -1.442695, %v639_v3  ;;  %v2634_v3 = vld [vmem:[#allocation3 + $0x38] sm:$0xff] }
 0x1b0   : > { %2071 = vtanh.f32 %v2539_v53  ;;  %v644_v54 = vpop.f32.mrb[6].mxu0 }
 0x1b1   : > { %v646_v55 = vpop.f32.mrb[7].mxu0  ;;  %v645_v5 = vadd.f32 %v644_v54, %v553_v62  ;;  %v1774_v54 = vld [vmem:[%s3056_s1 + $0x150] sm:$0xff]  ;;  %v1776_v62 = vld [vmem:[%s3056_s1 + $0x160] sm:$0xff] }
 0x1b2   : > { %v2068_v56 = vpop.eup %2067  ;;  %v2542_v57 = vadd.f32 %v646_v55, %v557_v41  ;;  %v1928_v41 = vpack.c.bf16 %v1771_v37, %v1769_v35  ;;  %v1777_v55 = vld [vmem:[%s3056_s1 + $0x168] sm:$0xff]  ;;  %v1794_v35 = vld [vmem:[%s3056_s1 + $0x1f0] sm:$0xff] }
 0x1b3   : > { %709 = vrot.lane.b32.xlu0 %v2068_v56, %s2269_s29  ;;  %v1759_v6 = vmul.f32 -1.442695, %v645_v5  ;;  %v1779_v56 = vld [vmem:[%s3056_s1 + $0x178] sm:$0xff]  ;;  %v1780_v5 = vld [vmem:[%s3056_s1 + $0x180] sm:$0xff] }
 0x1b4   : > { %2073 = vtanh.f32 %v2542_v57  ;;  %1929 = vmatprep.subr.bf16.mxu1 %v1928_v41 }
 0x1b5   : > { %2075 = vpow2.f32 %v1756_v0  ;;  %1931 = vmatpush1.bf16.msra.mxu1 %v1930_v46  ;;  %v1781_v0 = vld [vmem:[%s3056_s1 + $0x188] sm:$0xff]  ;;  %v1762_v46 = vmul.f32 -1.442695, %v2539_v53 }
 0x1b6   : > { %v2070_v58 = vpop.eup %2069  ;;  %2077 = vpow2.f32 %v1757_v2  ;;  %1933 = vmatprep.subr.bf16.mxu1 %v1932_v49  ;;  %v1938_v2 = vpack.c.bf16 %v1778_v63, %v1776_v62  ;;  %v1763_v49 = vmul.f32 -1.442695, %v2542_v57 }
 0x1b7   : > { %711 = vrot.lane.b32.xlu1 %v2070_v58, %s2269_s29  ;;  %2079 = vpow2.f32 %v1758_v4  ;;  %v1934_v58 = vpack.c.bf16 %v1774_v54, %v1772_v50  ;;  %v1940_v4 = vpack.c.bf16 %v1783_v1, %v1781_v0 }
 0x1b8   : > { %2081 = vpow2.f32 %v1759_v6  ;;  %v1782_v6 = vld [vmem:[%s3056_s1 + $0x190] sm:$0xff] }
 0x1b9   : > { %1935 = vmatpush1.bf16.msra.mxu1 %v1934_v58 }
 0x1ba   : > { %v2072_v59 = vpop.eup %2071 }
 0x1bb   : > { %713 = vrot.lane.b32.xlu0 %v2072_v59, %s2269_s29  ;;  %v2618_v59 = vld [vmem:[#allocation3 + $0x30] sm:$0xff] }
 0x1be   : > { %v2074_v60 = vpop.eup %2073 }
 0x1bf   : > { %715 = vrot.lane.b32.xlu1 %v2074_v60, %s2269_s29  ;;  %v2076_v7 = vpop.eup %2075  ;;  %v1936_v60 = vpack.c.bf16 %v1779_v56, %v1777_v55 }
 0x1c0   : > { %v661_v8 = vadd.f32 1.0, %v2076_v7  ;;  %v2078_v9 = vpop.eup %2077  ;;  %v1785_v7 = vld [vmem:[%s3056_s1 + $0x1a8] sm:$0xff] }
 0x1c1   : > { %v662_v10 = vadd.f32 1.0, %v2078_v9  ;;  %v2080_v11 = vpop.eup %2079  ;;  %1937 = vmatprep.subr.bf16.mxu1 %v1936_v60  ;;  %v1942_v9 = vpack.c.bf16 %v1782_v6, %v1780_v5 }
 0x1c2   : > { %2083 = vrcp.f32 %v661_v8  ;;  %v663_v12 = vadd.f32 1.0, %v2080_v11  ;;  %v2082_v13 = vpop.eup %2081  ;;  %v1787_v8 = vld [vmem:[%s3056_s1 + $0x1b8] sm:$0xff]  ;;  %1939 = vmatpush1.bf16.msra.mxu1 %v1938_v2 }
 0x1c3   : > { %2085 = vrcp.f32 %v662_v10  ;;  %v664_v14 = vadd.f32 1.0, %v2082_v13  ;;  %1941 = vmatprep.subr.bf16.mxu1 %v1940_v4  ;;  %v1944_v10 = vpack.c.bf16 %v1787_v8, %v1785_v7  ;;  %v1784_v13 = vld [vmem:[%s3056_s1 + $0x1a0] sm:$0xff] }
 0x1c4   : > { %2087 = vrcp.f32 %v663_v12 }
 0x1c5   : > { %2089 = vrcp.f32 %v664_v14  ;;  %v1786_v14 = vld [vmem:[%s3056_s1 + $0x1b0] sm:$0xff] }
 0x1c6   : > { %1943 = vmatpush1.bf16.msra.mxu1 %v1942_v9 }
 0x1c7   : > { %1945 = vmatprep.subr.bf16.mxu1 %v1944_v10 }
 0x1cc   : > { %v2552_v15 = vpop.eup %2083 }
 0x1cd   : > { %v2556_v18 = vpop.eup %2085  ;;  %v701_v11 = vmul.f32 %v2552_v15, %v2396_v28  ;;  %v1789_v28 = vld [vmem:[%s3056_s1 + $0x1c8] sm:$0xff] }
 0x1ce   : > { %v2560_v21 = vpop.eup %2087 }
 0x1cf   : > { %v2564_v24 = vpop.eup %2089 }
 0x1d0   : > { %v704_v36 = vmul.f32 %v2564_v24, %v2451_v52  ;;  %v1760_v52 = vmul.f32 -1.442695, %v2533_v45 }
 0x225   : > { %v710_v16 = vpop.permute.xlu0 %709 }
 0x226   : > { %v721_v17 = vmul.f32 %v2552_v15, %v710_v16  ;;  %v1791_v15 = vld [vmem:[%s3056_s1 + $0x1d8] sm:$0xff] }
 0x228   : > { %729 = vrot.lane.b32.xlu0 %v721_v17, %s2269_s29  ;;  %v1946_v17 = vpack.c.bf16 %v1786_v14, %v1784_v13 }
 0x229   : > { %v712_v19 = vpop.permute.xlu1 %711 }
 0x22a   : > { %v722_v20 = vmul.f32 %v2556_v18, %v712_v19  ;;  %v702_v19 = vmul.f32 %v2556_v18, %v2433_v44  ;;  %1947 = vmatpush1.bf16.msra.mxu1 %v1946_v17 }
 0x22c   : > { %731 = vrot.lane.b32.xlu1 %v722_v20, %s2269_s29 }
 0x22d   : > { %v714_v22 = vpop.permute.xlu0 %713 }
 0x22e   : > { %v723_v23 = vmul.f32 %v2560_v21, %v714_v22  ;;  %v1948_v22 = vpack.c.bf16 %v1791_v15, %v1789_v28 }
 0x230   : > { %733 = vrot.lane.b32.xlu0 %v723_v23, %s2269_s29  ;;  %v1788_v23 = vld [vmem:[%s3056_s1 + $0x1c0] sm:$0xff]  ;;  %1949 = vmatprep.subr.bf16.mxu1 %v1948_v22 }
 0x231   : > { %v716_v25 = vpop.permute.xlu1 %715 }
 0x232   : > { %v724_v26 = vmul.f32 %v2564_v24, %v716_v25  ;;  %v1790_v25 = vld [vmem:[%s3056_s1 + $0x1d0] sm:$0xff]  ;;  %v1761_v24 = vmul.f32 -1.442695, %v2536_v48 }
 0x233   : > { %v1950_v18 = vpack.c.bf16 %v1790_v25, %v1788_v23 }
 0x234   : > { %735 = vrot.lane.b32.xlu1 %v724_v26, %s2269_s29  ;;  %v703_v26 = vmul.f32 %v2560_v21, %v2449_v51  ;;  %v1954_v21 = vpack.c.bf16 %v1794_v35, %v1792_v34 }
 0x235   : > { %1951 = vmatpush1.bf16.msra.mxu1 %v1950_v18 }
 0x236   : > { %1953 = vmatprep.subr.bf16.mxu1 %v1952_v32 }
 0x238   : > { %790 = vrot.lane.b32.xlu1 %v2568_v27, %s2269_s29 }
 0x239   : > { %1955 = vmatpush1.bf16.msra.mxu1 %v1954_v21 }
 0x23c   : > { %792 = vrot.lane.b32.xlu1 %v2602_v47, %s2269_s29 }
 0x240   : > { %794 = vrot.lane.b32.xlu1 %v2618_v59, %s2269_s29 }
 0x244   : > { %796 = vrot.lane.b32.xlu1 %v2634_v3, %s2269_s29 }
 0x29a   : > { %v730_v12 = vpop.permute.xlu0 %729 }
 0x29b   : > { %v2658_v16 = vadd.f32 %v730_v12, %v701_v11 }
 0x29d   : > { %2091 = vtanh.f32 %v2658_v16 }
 0x29e   : > { %v732_v20 = vpop.permute.xlu1 %731 }
 0x29f   : > { %v2675_v44 = vadd.f32 %v732_v20, %v702_v19  ;;  %v1796_v19 = vld [vmem:[%s3057_s2 + $0x2] sm:$0x3] }
 0x2a0   : > { %v853_v28 = vrot.slane %v1796_v19, %v2527_v39 }
 0x2a1   : > { %2093 = vtanh.f32 %v2675_v44 }
 0x2a2   : > { %v734_v31 = vpop.permute.xlu0 %733 }
 0x2a3   : > { %v743_v51 = vadd.f32 %v734_v31, %v703_v26 }
 0x2a5   : > { %2095 = vtanh.f32 %v743_v51 }
 0x2a6   : > { %v736_v37 = vpop.permute.xlu1 %735 }
 0x2a7   : > { %v2092_v38 = vpop.eup %2091  ;;  %v2694_v40 = vadd.f32 %v736_v37, %v704_v36  ;;  %v849_v36 = vrot.slane %v1796_v19, %v2549_v61  ;;  %v1811_v19 = vld [vmem:[%s3056_s1 + $0x230] sm:$0xff] }
 0x2a8   : > { %753 = vrot.lane.b32.xlu0 %v2092_v38, %s2269_s29 }
 0x2a9   : > { %2097 = vtanh.f32 %v2694_v40 }
 0x2aa   : > { %2099 = vpow2.f32 %v1760_v52  ;;  %v791_v45 = vpop.permute.xlu1 %790 }
 0x2ab   : > { %v2094_v41 = vpop.eup %2093  ;;  %2101 = vpow2.f32 %v1761_v24 }
 0x2ac   : > { %755 = vrot.lane.b32.xlu0 %v2094_v41, %s2269_s29  ;;  %2103 = vpow2.f32 %v1762_v46 }
 0x2ad   : > { %2105 = vpow2.f32 %v1763_v49 }
 0x2ae   : > { %v793_v53 = vpop.permute.xlu1 %792 }
 0x2af   : > { %v2096_v42 = vpop.eup %2095 }
 0x2b0   : > { %757 = vrot.lane.b32.xlu0 %v2096_v42, %s2269_s29 }
 0x2b2   : > { %v795_v5 = vpop.permute.xlu1 %794 }
 0x2b3   : > { %v2098_v43 = vpop.eup %2097 }
 0x2b4   : > { %759 = vrot.lane.b32.xlu0 %v2098_v43, %s2269_s29  ;;  %v2100_v50 = vpop.eup %2099 }
 0x2b5   : > { %v685_v54 = vadd.f32 1.0, %v2100_v50  ;;  %v2102_v55 = vpop.eup %2101 }
 0x2b6   : > { %v686_v56 = vadd.f32 1.0, %v2102_v55  ;;  %v2104_v58 = vpop.eup %2103  ;;  %v797_v13 = vpop.permute.xlu1 %796 }
 0x2b7   : > { %2107 = vrcp.f32 %v685_v54  ;;  %v687_v60 = vadd.f32 1.0, %v2104_v58  ;;  %v2106_v62 = vpop.eup %2105 }
 0x2b8   : > { %2109 = vrcp.f32 %v686_v56  ;;  %v688_v63 = vadd.f32 1.0, %v2106_v62 }
 0x2b9   : > { %2111 = vrcp.f32 %v687_v60 }
 0x2ba   : > { %2113 = vrcp.f32 %v688_v63 }
 0x2c1   : > { %v2108_v48 = vpop.eup %2107 }
 0x2c2   : > { %v2110_v57 = vpop.eup %2109 }
 0x2c3   : > { %v2112_v6 = vpop.eup %2111 }
 0x2c4   : > { %v2114_v10 = vpop.eup %2113 }
 0x31a   : > { %v754_v0 = vpop.permute.xlu0 %753 }
 0x31b   : > { %v765_v1 = vmul.f32 %v2108_v48, %v754_v0 }
 0x31d   : > { %769 = vst.msk [vmem:[#allocation3] sm:$0xff] %vm482_vm0, %v765_v1  ;;  %777 = vst.msk [vmem:[#allocation2] sm:$0xff] %vm482_vm0, %v765_v1 }
 0x31e   : > { %773 = vst.msk [vmem:[#allocation3] sm:$0xff] %vm507_vm3, %v2658_v16  ;;  %802 = vst.msk [vmem:[#allocation2] sm:$0xff] %vm507_vm3, %v791_v45  ;;  %v756_v2 = vpop.permute.xlu0 %755 }
 0x31f   : > { %v766_v4 = vmul.f32 %v2110_v57, %v756_v2 }
 0x321   : > { %770 = vst.msk [vmem:[#allocation3 + $0x8] sm:$0xff] %vm482_vm0, %v766_v4  ;;  %778 = vst.msk [vmem:[#allocation2 + $0x8] sm:$0xff] %vm482_vm0, %v766_v4 }
 0x322   : > { %774 = vst.msk [vmem:[#allocation3 + $0x8] sm:$0xff] %vm507_vm3, %v2675_v44  ;;  %803 = vst.msk [vmem:[#allocation2 + $0x8] sm:$0xff] %vm507_vm3, %v793_v53  ;;  %v758_v7 = vpop.permute.xlu0 %757 }
 0x323   : > { %v767_v8 = vmul.f32 %v2112_v6, %v758_v7  ;;  %v2764_v7 = vld [vmem:[#allocation3 + $0x40] sm:$0xff] }
 0x325   : > { %771 = vst.msk [vmem:[#allocation3 + $0x10] sm:$0xff] %vm482_vm0, %v767_v8  ;;  %779 = vst.msk [vmem:[#allocation2 + $0x10] sm:$0xff] %vm482_vm0, %v767_v8  ;;  %v806_v9 = vld [vmem:[#allocation2] sm:$0xff]  ;;  %v1806_v8 = vld [vmem:[%s3056_s1 + $0x208] sm:$0xff] }
 0x326   : > { %775 = vst.msk [vmem:[#allocation3 + $0x10] sm:$0xff] %vm507_vm3, %v743_v51  ;;  %804 = vst.msk [vmem:[#allocation2 + $0x10] sm:$0xff] %vm507_vm3, %v795_v5  ;;  %921 = vmatmul.mubr.f32.vlgmr.msra.gmra.mrb[0].mxu1 %v806_v9  ;;  %v760_v11 = vpop.permute.xlu0 %759  ;;  %v1808_v9 = vld [vmem:[%s3056_s1 + $0x218] sm:$0xff] }
 0x327   : > { %v768_v12 = vmul.f32 %v2114_v10, %v760_v11  ;;  %926 = vmatprep.mubr.f32.mxu1 %v2268_v33  ;;  %v1956_v10 = vpack.c.bf16 %v1808_v9, %v1806_v8  ;;  %v1805_v11 = vld [vmem:[%s3056_s1 + $0x200] sm:$0xff]  ;;  %v1834_v8 = vld [vmem:[%s3056_s1 + $0x2e8] sm:$0xff]  ;;  %v1836_v9 = vld [vmem:[%s3056_s1 + $0x2f8] sm:$0xff] }
 0x329   : > { %772 = vst.msk [vmem:[#allocation3 + $0x18] sm:$0xff] %vm482_vm0, %v768_v12  ;;  %780 = vst.msk [vmem:[#allocation2 + $0x18] sm:$0xff] %vm482_vm0, %v768_v12  ;;  %v807_v14 = vld [vmem:[#allocation2 + $0x8] sm:$0xff]  ;;  %v1807_v12 = vld [vmem:[%s3056_s1 + $0x210] sm:$0xff]  ;;  %1957 = vmatprep.subr.bf16.mxu0 %v1956_v10 }
 0x32a   : > { %776 = vst.msk [vmem:[#allocation3 + $0x18] sm:$0xff] %vm507_vm3, %v2694_v40  ;;  %805 = vst.msk [vmem:[#allocation2 + $0x18] sm:$0xff] %vm507_vm3, %v797_v13  ;;  %927 = vmatmul.mubr.f32.gmra.mrb[2].mxu1 %v807_v14  ;;  %v1810_v13 = vld [vmem:[%s3056_s1 + $0x228] sm:$0xff]  ;;  %v1958_v14 = vpack.c.bf16 %v1807_v12, %v1805_v11  ;;  %v1984_v11 = vpack.c.bf16 %v1836_v9, %v1834_v8  ;;  %v1833_v12 = vld [vmem:[%s3056_s1 + $0x2e0] sm:$0xff] }
 0x32b   : > { %932 = vmatprep.mubr.f32.mxu1 %v2268_v33 }
 0x32c   : > { %1959 = vmatpush1.bf16.msra.mxu0 %v1958_v14 }
 0x32d   : > { %v808_v16 = vld [vmem:[#allocation2 + $0x10] sm:$0xff] }
 0x32e   : > { %933 = vmatmul.mubr.f32.gmra.mrb[4].mxu1 %v808_v16  ;;  %v1812_v16 = vld [vmem:[%s3056_s1 + $0x238] sm:$0xff] }
 0x32f   : > { %938 = vmatprep.mubr.f32.mxu1 %v2268_v33 }
 0x331   : > { %v809_v17 = vld [vmem:[#allocation2 + $0x18] sm:$0xff] }
 0x332   : > { %939 = vmatmul.mubr.f32.gmra.mrb[6].mxu1 %v809_v17  ;;  %v1809_v17 = vld [vmem:[%s3056_s1 + $0x220] sm:$0xff] }
 0x3f9   : > { %v922_v15 = vpop.f32.mrb[0].mxu1 }
 0x3fa   : > { %v924_v20 = vpop.f32.mrb[1].mxu1  ;;  %v923_v37 = vadd.f32 %v922_v15, %v849_v36  ;;  %v1814_v15 = vld [vmem:[%s3056_s1 + $0x248] sm:$0xff] }
 0x3fb   : > { %v2731_v22 = vadd.f32 %v924_v20, %v853_v28  ;;  %v1816_v20 = vld [vmem:[%s3056_s1 + $0x258] sm:$0xff] }
 0x3fc   : > { %v1797_v38 = vmul.f32 -1.442695, %v923_v37  ;;  %v1819_v37 = vld [vmem:[%s3056_s1 + $0x270] sm:$0xff] }
 0x3fd   : > { %2115 = vtanh.f32 %v2731_v22  ;;  %v928_v23 = vpop.f32.mrb[2].mxu1 }
 0x3fe   : > { %v930_v25 = vpop.f32.mrb[3].mxu1  ;;  %v929_v40 = vadd.f32 %v928_v23, %v849_v36  ;;  %v1962_v23 = vpack.c.bf16 %v1811_v19, %v1809_v17 }
 0x3ff   : > { %v2734_v44 = vadd.f32 %v930_v25, %v853_v28  ;;  %v2798_v25 = vld [vmem:[#allocation3 + $0x48] sm:$0xff] }
 0x400   : > { %v1798_v41 = vmul.f32 -1.442695, %v929_v40  ;;  %v1824_v40 = vld [vmem:[%s3056_s1 + $0x298] sm:$0xff] }
 0x401   : > { %2117 = vtanh.f32 %v2734_v44  ;;  %v934_v18 = vpop.f32.mrb[4].mxu1 }
 0x402   : > { %v936_v26 = vpop.f32.mrb[5].mxu1  ;;  %v935_v42 = vadd.f32 %v934_v18, %v849_v36  ;;  %v1964_v18 = vpack.c.bf16 %v1816_v20, %v1814_v15 }
 0x403   : > { %v2737_v29 = vadd.f32 %v936_v26, %v853_v28  ;;  %v1813_v26 = vld [vmem:[%s3056_s1 + $0x240] sm:$0xff] }
 0x404   : > { %v1799_v43 = vmul.f32 -1.442695, %v935_v42  ;;  %v2830_v42 = vld [vmem:[#allocation3 + $0x58] sm:$0xff] }
 0x405   : > { %2119 = vtanh.f32 %v2737_v29  ;;  %v940_v30 = vpop.f32.mrb[6].mxu1 }
 0x406   : > { %v942_v31 = vpop.f32.mrb[7].mxu1  ;;  %v941_v52 = vadd.f32 %v940_v30, %v849_v36  ;;  %v1815_v30 = vld [vmem:[%s3056_s1 + $0x250] sm:$0xff]  ;;  %v1817_v36 = vld [vmem:[%s3056_s1 + $0x260] sm:$0xff] }
 0x407   : > { %v2116_v32 = vpop.eup %2115  ;;  %v2740_v34 = vadd.f32 %v942_v31, %v853_v28  ;;  %v1960_v28 = vpack.c.bf16 %v1812_v16, %v1810_v13  ;;  %v1818_v31 = vld [vmem:[%s3056_s1 + $0x268] sm:$0xff]  ;;  %v1835_v13 = vld [vmem:[%s3056_s1 + $0x2f0] sm:$0xff] }
 0x408   : > { %1005 = vrot.lane.b32.xlu0 %v2116_v32, %s2269_s29  ;;  %v1800_v24 = vmul.f32 -1.442695, %v941_v52  ;;  %v1820_v32 = vld [vmem:[%s3056_s1 + $0x278] sm:$0xff]  ;;  %v1821_v52 = vld [vmem:[%s3056_s1 + $0x280] sm:$0xff] }
 0x409   : > { %2121 = vtanh.f32 %v2740_v34  ;;  %1961 = vmatprep.subr.bf16.mxu0 %v1960_v28 }
 0x40a   : > { %2123 = vpow2.f32 %v1797_v38  ;;  %1963 = vmatpush1.bf16.msra.mxu0 %v1962_v23  ;;  %v1822_v38 = vld [vmem:[%s3056_s1 + $0x288] sm:$0xff]  ;;  %v1803_v23 = vmul.f32 -1.442695, %v2737_v29 }
 0x40b   : > { %v2118_v35 = vpop.eup %2117  ;;  %2125 = vpow2.f32 %v1798_v41  ;;  %1965 = vmatprep.subr.bf16.mxu0 %v1964_v18  ;;  %v1970_v41 = vpack.c.bf16 %v1819_v37, %v1817_v36  ;;  %v1804_v18 = vmul.f32 -1.442695, %v2740_v34 }
 0x40c   : > { %1007 = vrot.lane.b32.xlu1 %v2118_v35, %s2269_s29  ;;  %2127 = vpow2.f32 %v1799_v43  ;;  %v1966_v35 = vpack.c.bf16 %v1815_v30, %v1813_v26  ;;  %v1972_v43 = vpack.c.bf16 %v1824_v40, %v1822_v38 }
 0x40d   : > { %2129 = vpow2.f32 %v1800_v24  ;;  %v1823_v24 = vld [vmem:[%s3056_s1 + $0x290] sm:$0xff] }
 0x40e   : > { %1967 = vmatpush1.bf16.msra.mxu0 %v1966_v35 }
 0x40f   : > { %v2120_v51 = vpop.eup %2119 }
 0x410   : > { %1009 = vrot.lane.b32.xlu0 %v2120_v51, %s2269_s29  ;;  %v2814_v51 = vld [vmem:[#allocation3 + $0x50] sm:$0xff] }
 0x413   : > { %v2122_v21 = vpop.eup %2121 }
 0x414   : > { %1011 = vrot.lane.b32.xlu1 %v2122_v21, %s2269_s29  ;;  %v2124_v46 = vpop.eup %2123  ;;  %v1968_v21 = vpack.c.bf16 %v1820_v32, %v1818_v31 }
 0x415   : > { %v957_v49 = vadd.f32 1.0, %v2124_v46  ;;  %v2126_v50 = vpop.eup %2125  ;;  %v1826_v46 = vld [vmem:[%s3056_s1 + $0x2a8] sm:$0xff] }
 0x416   : > { %v958_v54 = vadd.f32 1.0, %v2126_v50  ;;  %v2128_v55 = vpop.eup %2127  ;;  %1969 = vmatprep.subr.bf16.mxu0 %v1968_v21  ;;  %v1974_v50 = vpack.c.bf16 %v1823_v24, %v1821_v52 }
 0x417   : > { %2131 = vrcp.f32 %v957_v49  ;;  %v959_v56 = vadd.f32 1.0, %v2128_v55  ;;  %v2130_v58 = vpop.eup %2129  ;;  %v1828_v49 = vld [vmem:[%s3056_s1 + $0x2b8] sm:$0xff]  ;;  %1971 = vmatpush1.bf16.msra.mxu0 %v1970_v41 }
 0x418   : > { %2133 = vrcp.f32 %v958_v54  ;;  %v960_v60 = vadd.f32 1.0, %v2130_v58  ;;  %1973 = vmatprep.subr.bf16.mxu0 %v1972_v43  ;;  %v1976_v54 = vpack.c.bf16 %v1828_v49, %v1826_v46  ;;  %v1825_v58 = vld [vmem:[%s3056_s1 + $0x2a0] sm:$0xff] }
 0x419   : > { %2135 = vrcp.f32 %v959_v56 }
 0x41a   : > { %2137 = vrcp.f32 %v960_v60  ;;  %v1827_v60 = vld [vmem:[%s3056_s1 + $0x2b0] sm:$0xff] }
 0x41b   : > { %1975 = vmatpush1.bf16.msra.mxu0 %v1974_v50 }
 0x41c   : > { %1977 = vmatprep.subr.bf16.mxu0 %v1976_v54 }
 0x421   : > { %v2748_v62 = vpop.eup %2131 }
 0x422   : > { %v2752_v48 = vpop.eup %2133  ;;  %v997_v55 = vmul.f32 %v2748_v62, %v2568_v27  ;;  %v1830_v27 = vld [vmem:[%s3056_s1 + $0x2c8] sm:$0xff] }
 0x423   : > { %v2756_v53 = vpop.eup %2135 }
 0x424   : > { %v2760_v4 = vpop.eup %2137 }
 0x425   : > { %v1000_v14 = vmul.f32 %v2760_v4, %v2634_v3  ;;  %v1801_v3 = vmul.f32 -1.442695, %v2731_v22 }
 0x47a   : > { %v1006_v45 = vpop.permute.xlu0 %1005 }
 0x47b   : > { %v1017_v63 = vmul.f32 %v2748_v62, %v1006_v45  ;;  %v1832_v62 = vld [vmem:[%s3056_s1 + $0x2d8] sm:$0xff] }
 0x47d   : > { %1025 = vrot.lane.b32.xlu0 %v1017_v63, %s2269_s29  ;;  %v1978_v63 = vpack.c.bf16 %v1827_v60, %v1825_v58 }
 0x47e   : > { %v1008_v0 = vpop.permute.xlu1 %1007 }
 0x47f   : > { %v1018_v1 = vmul.f32 %v2752_v48, %v1008_v0  ;;  %v998_v0 = vmul.f32 %v2752_v48, %v2602_v47  ;;  %1979 = vmatpush1.bf16.msra.mxu0 %v1978_v63 }
 0x481   : > { %1027 = vrot.lane.b32.xlu1 %v1018_v1, %s2269_s29 }
 0x482   : > { %v1010_v57 = vpop.permute.xlu0 %1009 }
 0x483   : > { %v1019_v2 = vmul.f32 %v2756_v53, %v1010_v57  ;;  %v1980_v57 = vpack.c.bf16 %v1832_v62, %v1830_v27 }
 0x485   : > { %1029 = vrot.lane.b32.xlu0 %v1019_v2, %s2269_s29  ;;  %v1829_v2 = vld [vmem:[%s3056_s1 + $0x2c0] sm:$0xff]  ;;  %1981 = vmatprep.subr.bf16.mxu0 %v1980_v57 }
 0x486   : > { %v1012_v5 = vpop.permute.xlu1 %1011 }
 0x487   : > { %v1020_v6 = vmul.f32 %v2760_v4, %v1012_v5  ;;  %v1831_v5 = vld [vmem:[%s3056_s1 + $0x2d0] sm:$0xff]  ;;  %v1802_v4 = vmul.f32 -1.442695, %v2734_v44 }
 0x488   : > { %v1982_v48 = vpack.c.bf16 %v1831_v5, %v1829_v2 }
 0x489   : > { %1031 = vrot.lane.b32.xlu1 %v1020_v6, %s2269_s29  ;;  %v999_v6 = vmul.f32 %v2756_v53, %v2618_v59  ;;  %v1986_v53 = vpack.c.bf16 %v1835_v13, %v1833_v12 }
 0x48a   : > { %1983 = vmatpush1.bf16.msra.mxu0 %v1982_v48 }
 0x48b   : > { %1985 = vmatprep.subr.bf16.mxu0 %v1984_v11 }
 0x48d   : > { %1086 = vrot.lane.b32.xlu1 %v2764_v7, %s2269_s29 }
 0x48e   : > { %1987 = vmatpush1.bf16.msra.mxu0 %v1986_v53 }
 0x491   : > { %1088 = vrot.lane.b32.xlu1 %v2798_v25, %s2269_s29 }
 0x495   : > { %1090 = vrot.lane.b32.xlu1 %v2814_v51, %s2269_s29 }
 0x499   : > { %1092 = vrot.lane.b32.xlu1 %v2830_v42, %s2269_s29 }
 0x4ef   : > { %v1026_v56 = vpop.permute.xlu0 %1025 }
 0x4f0   : > { %v2854_v45 = vadd.f32 %v1026_v56, %v997_v55 }
 0x4f2   : > { %2139 = vtanh.f32 %v2854_v45 }
 0x4f3   : > { %v1028_v1 = vpop.permute.xlu1 %1027 }
 0x4f4   : > { %v2871_v47 = vadd.f32 %v1028_v1, %v998_v0  ;;  %v1837_v0 = vld [vmem:[%s3057_s2 + $0x4] sm:$0x3] }
 0x4f5   : > { %v1149_v27 = vrot.slane %v1837_v0, %v2527_v39 }
 0x4f6   : > { %2141 = vtanh.f32 %v2871_v47 }
 0x4f7   : > { %v1030_v10 = vpop.permute.xlu0 %1029 }
 0x4f8   : > { %v1039_v59 = vadd.f32 %v1030_v10, %v999_v6 }
 0x4fa   : > { %2143 = vtanh.f32 %v1039_v59 }
 0x4fb   : > { %v1032_v16 = vpop.permute.xlu1 %1031 }
 0x4fc   : > { %v2140_v17 = vpop.eup %2139  ;;  %v2890_v19 = vadd.f32 %v1032_v16, %v1000_v14 }
 0x4fd   : > { %1049 = vrot.lane.b32.xlu0 %v2140_v17, %s2269_s29 }
 0x4fe   : > { %2145 = vtanh.f32 %v2890_v19 }
 0x4ff   : > { %2147 = vpow2.f32 %v1801_v3  ;;  %v1087_v22 = vpop.permute.xlu1 %1086 }
 0x500   : > { %v2142_v28 = vpop.eup %2141  ;;  %2149 = vpow2.f32 %v1802_v4 }
 0x501   : > { %1051 = vrot.lane.b32.xlu0 %v2142_v28, %s2269_s29  ;;  %2151 = vpow2.f32 %v1803_v23 }
 0x502   : > { %2153 = vpow2.f32 %v1804_v18 }
 0x503   : > { %v1089_v29 = vpop.permute.xlu1 %1088 }
 0x504   : > { %v2144_v15 = vpop.eup %2143 }
 0x505   : > { %1053 = vrot.lane.b32.xlu0 %v2144_v15, %s2269_s29 }
 0x507   : > { %v1091_v52 = vpop.permute.xlu1 %1090 }
 0x508   : > { %v2146_v20 = vpop.eup %2145 }
 0x509   : > { %1055 = vrot.lane.b32.xlu0 %v2146_v20, %s2269_s29  ;;  %v2148_v26 = vpop.eup %2147 }
 0x50a   : > { %v981_v30 = vadd.f32 1.0, %v2148_v26  ;;  %v2150_v31 = vpop.eup %2149 }
 0x50b   : > { %v982_v32 = vadd.f32 1.0, %v2150_v31  ;;  %v2152_v35 = vpop.eup %2151  ;;  %v1093_v58 = vpop.permute.xlu1 %1092 }
 0x50c   : > { %2155 = vrcp.f32 %v981_v30  ;;  %v983_v21 = vadd.f32 1.0, %v2152_v35  ;;  %v2154_v36 = vpop.eup %2153 }
 0x50d   : > { %2157 = vrcp.f32 %v982_v32  ;;  %v984_v37 = vadd.f32 1.0, %v2154_v36 }
 0x50e   : > { %2159 = vrcp.f32 %v983_v21 }
 0x50f   : > { %2161 = vrcp.f32 %v984_v37 }
 0x516   : > { %v2156_v44 = vpop.eup %2155 }
 0x517   : > { %v2158_v34 = vpop.eup %2157 }
 0x518   : > { %v2160_v24 = vpop.eup %2159 }
 0x519   : > { %v2162_v54 = vpop.eup %2161 }
 0x56f   : > { %v1050_v38 = vpop.permute.xlu0 %1049 }
 0x570   : > { %v1061_v40 = vmul.f32 %v2156_v44, %v1050_v38 }
 0x572   : > { %1065 = vst.msk [vmem:[#allocation3 + $0x20] sm:$0xff] %vm482_vm0, %v1061_v40  ;;  %1073 = vst.msk [vmem:[#allocation2] sm:$0xff] %vm482_vm0, %v1061_v40 }
 0x573   : > { %1069 = vst.msk [vmem:[#allocation3 + $0x20] sm:$0xff] %vm507_vm3, %v2854_v45  ;;  %1098 = vst.msk [vmem:[#allocation2] sm:$0xff] %vm507_vm3, %v1087_v22  ;;  %v1052_v41 = vpop.permute.xlu0 %1051 }
 0x574   : > { %v1062_v43 = vmul.f32 %v2158_v34, %v1052_v41 }
 0x576   : > { %1066 = vst.msk [vmem:[#allocation3 + $0x28] sm:$0xff] %vm482_vm0, %v1062_v43  ;;  %1074 = vst.msk [vmem:[#allocation2 + $0x8] sm:$0xff] %vm482_vm0, %v1062_v43  ;;  %v1369_v43 = vld [vmem:[%s3058_s3] sm:$0xff] }
 0x577   : > { %1070 = vst.msk [vmem:[#allocation3 + $0x28] sm:$0xff] %vm507_vm3, %v2871_v47  ;;  %1099 = vst.msk [vmem:[#allocation2 + $0x8] sm:$0xff] %vm507_vm3, %v1089_v29  ;;  %v1054_v46 = vpop.permute.xlu0 %1053 }
 0x578   : > { %v1063_v49 = vmul.f32 %v2160_v24, %v1054_v46  ;;  %v1371_v24 = vld [vmem:[%s3058_s3 + $0x10] sm:$0xff] }
 0x57a   : > { %1067 = vst.msk [vmem:[#allocation3 + $0x30] sm:$0xff] %vm482_vm0, %v1063_v49  ;;  %1075 = vst.msk [vmem:[#allocation2 + $0x10] sm:$0xff] %vm482_vm0, %v1063_v49  ;;  %v1102_v50 = vld [vmem:[#allocation2] sm:$0xff]  ;;  %v1372_v49 = vld [vmem:[%s3058_s3 + $0x18] sm:$0xff] }
 0x57b   : > { %1071 = vst.msk [vmem:[#allocation3 + $0x30] sm:$0xff] %vm507_vm3, %v1039_v59  ;;  %1100 = vst.msk [vmem:[#allocation2 + $0x10] sm:$0xff] %vm507_vm3, %v1091_v52  ;;  %1217 = vmatmul.mubr.f32.vlgmr.msra.gmra.mrb[8].mxu0 %v1102_v50  ;;  %v1056_v55 = vpop.permute.xlu0 %1055  ;;  %v1145_v59 = vrot.slane %v1837_v0, %v2549_v61  ;;  %v1370_v52 = vld [vmem:[%s3058_s3 + $0x8] sm:$0xff]  ;;  %v1992_v50 = vpack.c.bf16 %v1372_v49, %v1371_v24  ;;  %v1376_v0 = vld [vmem:[%s3058_s3 + $0x38] sm:$0xff] }
 0x57c   : > { %v1064_v56 = vmul.f32 %v2162_v54, %v1056_v55  ;;  %1222 = vmatprep.mubr.f32.mxu0 %v2268_v33  ;;  %v1988_v46 = vpack.c.bf16 %v1370_v52, %v1369_v43  ;;  %v1373_v54 = vld [vmem:[%s3058_s3 + $0x20] sm:$0xff]  ;;  %v1374_v55 = vld [vmem:[%s3058_s3 + $0x28] sm:$0xff]  ;;  %v1492_v43 = vld [vmem:[#allocation3 + $0x18] sm:$0xff] (!%p1851_p2) }
 0x57d   : > { %v1493_v52 = vld [vmem:[#allocation3 + $0x20] sm:$0xff] (!%p1851_p2)  ;;  %1504 = vst [vmem:[%s2390_s10 + $0x18] sm:$0xff] (!%p1851_p2), %v1492_v43 }
 0x57e   : > { %1068 = vst.msk [vmem:[#allocation3 + $0x38] sm:$0xff] %vm482_vm0, %v1064_v56  ;;  %1076 = vst.msk [vmem:[#allocation2 + $0x18] sm:$0xff] %vm482_vm0, %v1064_v56  ;;  %v1103_v60 = vld [vmem:[#allocation2 + $0x8] sm:$0xff]  ;;  %1989 = vmatprep.subr.bf16.mxu1 %v1988_v46  ;;  %v1996_v56 = vpack.c.bf16 %v1374_v55, %v1373_v54 }
 0x57f   : > { %1072 = vst.msk [vmem:[#allocation3 + $0x38] sm:$0xff] %vm507_vm3, %v2890_v19  ;;  %1101 = vst.msk [vmem:[#allocation2 + $0x18] sm:$0xff] %vm507_vm3, %v1093_v58  ;;  %1223 = vmatmul.mubr.f32.gmra.mrb[10].mxu0 %v1103_v60  ;;  %1991 = vmatpush3.bf16.msra.mxu1 %v1988_v46  ;;  %v1494_v24 = vld [vmem:[#allocation3 + $0x28] sm:$0xff] (!%p1851_p2) }
 0x580   : > { %1228 = vmatprep.mubr.f32.mxu0 %v2268_v33  ;;  %1993 = vmatprep.subr.bf16.mxu1 %v1992_v50  ;;  %1505 = vst [vmem:[%s2390_s10 + $0x20] sm:$0xff] (!%p1851_p2), %v1493_v52  ;;  %1506 = vst [vmem:[%s2390_s10 + $0x28] sm:$0xff] (!%p1851_p2), %v1494_v24 }
 0x582   : > { %v1104_v45 = vld [vmem:[#allocation2 + $0x10] sm:$0xff] }
 0x583   : > { %1229 = vmatmul.mubr.f32.gmra.mrb[12].mxu0 %v1104_v45  ;;  %1995 = vmatpush3.bf16.msra.mxu1 %v1992_v50  ;;  %v1495_v46 = vld [vmem:[#allocation3 + $0x30] sm:$0xff] (!%p1851_p2) }
 0x584   : > { %1234 = vmatprep.mubr.f32.mxu0 %v2268_v33  ;;  %1997 = vmatprep.subr.bf16.mxu1 %v1996_v56  ;;  %1507 = vst [vmem:[%s2390_s10 + $0x30] sm:$0xff] (!%p1851_p2), %v1495_v46 }
 0x586   : > { %v1105_v63 = vld [vmem:[#allocation2 + $0x18] sm:$0xff] }
 0x587   : > { %1235 = vmatmul.mubr.f32.gmra.mrb[14].mxu0 %v1105_v63  ;;  %1999 = vmatpush3.bf16.msra.mxu1 %v1996_v56  ;;  %v1375_v63 = vld [vmem:[%s3058_s3 + $0x30] sm:$0xff]  ;;  %v1496_v49 = vld [vmem:[#allocation3 + $0x38] sm:$0xff] (!%p1851_p2) }
 0x588   : > { %1508 = vst [vmem:[%s2390_s10 + $0x38] sm:$0xff] (!%p1851_p2), %v1496_v49 }
 0x64e   : > { %v1218_v62 = vpop.f32.mrb[8].mxu0 }
 0x64f   : > { %v1220_v1 = vpop.f32.mrb[9].mxu0  ;;  %v1219_v53 = vadd.f32 %v1218_v62, %v1145_v59  ;;  %v2000_v62 = vpack.c.bf16 %v1376_v0, %v1375_v63 }
 0x650   : > { %v2927_v57 = vadd.f32 %v1220_v1, %v1149_v27 }
 0x651   : > { %v1838_v14 = vmul.f32 -1.442695, %v1219_v53  ;;  %2001 = vmatprep.subr.bf16.mxu1 %v2000_v62 }
 0x652   : > { %2163 = vtanh.f32 %v2927_v57  ;;  %v1224_v2 = vpop.f32.mrb[10].mxu0  ;;  %2003 = vmatpush3.bf16.msra.mxu1 %v2000_v62 }
 0x653   : > { %v1226_v5 = vpop.f32.mrb[11].mxu0  ;;  %v1225_v16 = vadd.f32 %v1224_v2, %v1145_v59 }
 0x654   : > { %v2930_v47 = vadd.f32 %v1226_v5, %v1149_v27 }
 0x655   : > { %v1839_v17 = vmul.f32 -1.442695, %v1225_v16 }
 0x656   : > { %2165 = vtanh.f32 %v2930_v47  ;;  %v1230_v33 = vpop.f32.mrb[12].mxu0 }
 0x657   : > { %v1232_v48 = vpop.f32.mrb[13].mxu0  ;;  %v1231_v19 = vadd.f32 %v1230_v33, %v1145_v59 }
 0x658   : > { %v2933_v6 = vadd.f32 %v1232_v48, %v1149_v27 }
 0x659   : > { %v1840_v28 = vmul.f32 -1.442695, %v1231_v19 }
 0x65a   : > { %2167 = vtanh.f32 %v2933_v6  ;;  %v1236_v8 = vpop.f32.mrb[14].mxu0 }
 0x65b   : > { %v1238_v39 = vpop.f32.mrb[15].mxu0  ;;  %v1237_v15 = vadd.f32 %v1236_v8, %v1145_v59 }
 0x65c   : > { %v2164_v9 = vpop.eup %2163  ;;  %v2936_v10 = vadd.f32 %v1238_v39, %v1149_v27 }
 0x65d   : > { %1301 = vrot.lane.b32.xlu0 %v2164_v9, %s2269_s29  ;;  %v1841_v20 = vmul.f32 -1.442695, %v1237_v15 }
 0x65e   : > { %2169 = vtanh.f32 %v2936_v10  ;;  %v1845_v59 = vmul.f32 -1.442695, %v2936_v10 }
 0x65f   : > { %2171 = vpow2.f32 %v1838_v14 }
 0x660   : > { %v2166_v11 = vpop.eup %2165  ;;  %2173 = vpow2.f32 %v1839_v17 }
 0x661   : > { %1303 = vrot.lane.b32.xlu1 %v2166_v11, %s2269_s29  ;;  %2175 = vpow2.f32 %v1840_v28 }
 0x662   : > { %2177 = vpow2.f32 %v1841_v20 }
 0x664   : > { %v2168_v12 = vpop.eup %2167 }
 0x665   : > { %1305 = vrot.lane.b32.xlu0 %v2168_v12, %s2269_s29 }
 0x668   : > { %v2170_v13 = vpop.eup %2169 }
 0x669   : > { %1307 = vrot.lane.b32.xlu1 %v2170_v13, %s2269_s29  ;;  %v2172_v3 = vpop.eup %2171  ;;  %v1844_v13 = vmul.f32 -1.442695, %v2933_v6 }
 0x66a   : > { %v1253_v4 = vadd.f32 1.0, %v2172_v3  ;;  %v2174_v23 = vpop.eup %2173 }
 0x66b   : > { %v1254_v18 = vadd.f32 1.0, %v2174_v23  ;;  %v2176_v26 = vpop.eup %2175 }
 0x66c   : > { %2179 = vrcp.f32 %v1253_v4  ;;  %v1255_v61 = vadd.f32 1.0, %v2176_v26  ;;  %v2178_v30 = vpop.eup %2177 }
 0x66d   : > { %2181 = vrcp.f32 %v1254_v18  ;;  %v1256_v31 = vadd.f32 1.0, %v2178_v30 }
 0x66e   : > { %2183 = vrcp.f32 %v1255_v61 }
 0x66f   : > { %2185 = vrcp.f32 %v1256_v31 }
 0x676   : > { %v2180_v32 = vpop.eup %2179 }
 0x677   : > { %v2182_v36 = vpop.eup %2181  ;;  %v1293_v58 = vmul.f32 %v2180_v32, %v2764_v7 }
 0x678   : > { %v2184_v44 = vpop.eup %2183  ;;  %v1294_v27 = vmul.f32 %v2182_v36, %v2798_v25 }
 0x679   : > { %v2186_v29 = vpop.eup %2185  ;;  %v1295_v7 = vmul.f32 %v2184_v44, %v2814_v51  ;;  %v1842_v51 = vmul.f32 -1.442695, %v2927_v57 }
 0x67a   : > { %v1296_v48 = vmul.f32 %v2186_v29, %v2830_v42  ;;  %v1843_v42 = vmul.f32 -1.442695, %v2930_v47 }
 0x6cf   : > { %v1302_v35 = vpop.permute.xlu0 %1301 }
 0x6d0   : > { %v1313_v21 = vmul.f32 %v2180_v32, %v1302_v35  ;;  %v1846_v32 = vld [vmem:[%s3059_s4] ss:$0 sm:$0xff] }
 0x6d2   : > { %1321 = vrot.lane.b32.xlu0 %v1313_v21, %s2269_s29 }
 0x6d3   : > { %v1304_v22 = vpop.permute.xlu1 %1303 }
 0x6d4   : > { %v1314_v37 = vmul.f32 %v2182_v36, %v1304_v22 }
 0x6d6   : > { %1323 = vrot.lane.b32.xlu1 %v1314_v37, %s2269_s29 }
 0x6d7   : > { %v1306_v38 = vpop.permute.xlu0 %1305 }
 0x6d8   : > { %v1315_v40 = vmul.f32 %v2184_v44, %v1306_v38 }
 0x6da   : > { %1325 = vrot.lane.b32.xlu0 %v1315_v40, %s2269_s29 }
 0x6db   : > { %v1308_v34 = vpop.permute.xlu1 %1307 }
 0x6dc   : > { %v1316_v41 = vmul.f32 %v2186_v29, %v1308_v34  ;;  %v1489_v29 = vld [vmem:[#allocation3] sm:$0xff] (!%p1851_p2)  ;;  %v1490_v34 = vld [vmem:[#allocation3 + $0x8] sm:$0xff] (!%p1851_p2) }
 0x6dd   : > { %1501 = vst [vmem:[%s2390_s10] sm:$0xff] (!%p1851_p2), %v1489_v29  ;;  %1502 = vst [vmem:[%s2390_s10 + $0x8] sm:$0xff] (!%p1851_p2), %v1490_v34 }
 0x6de   : > { %1327 = vrot.lane.b32.xlu1 %v1316_v41, %s2269_s29  ;;  %v1491_v41 = vld [vmem:[#allocation3 + $0x10] sm:$0xff] (!%p1851_p2) }
 0x6df   : > { %1503 = vst [vmem:[%s2390_s10 + $0x10] sm:$0xff] (!%p1851_p2), %v1491_v41 }
 0x744   : > { %v1322_v60 = vpop.permute.xlu0 %1321 }
 0x745   : > { %v1333_v45 = vadd.f32 %v1322_v60, %v1293_v58 }
 0x747   : > { %2187 = vtanh.f32 %v1333_v45 }
 0x748   : > { %v1324_v1 = vpop.permute.xlu1 %1323 }
 0x749   : > { %v1334_v2 = vadd.f32 %v1324_v1, %v1294_v27 }
 0x74b   : > { %2189 = vtanh.f32 %v1334_v2 }
 0x74c   : > { %v1326_v5 = vpop.permute.xlu0 %1325 }
 0x74d   : > { %v1335_v33 = vadd.f32 %v1326_v5, %v1295_v7 }
 0x74f   : > { %2191 = vtanh.f32 %v1335_v33 }
 0x750   : > { %v1328_v8 = vpop.permute.xlu1 %1327 }
 0x751   : > { %v2188_v39 = vpop.eup %2187  ;;  %v1336_v9 = vadd.f32 %v1328_v8, %v1296_v48 }
 0x752   : > { %1345 = vrot.lane.b32.xlu0 %v2188_v39, %s2269_s29 }
 0x753   : > { %2193 = vtanh.f32 %v1336_v9 }
 0x754   : > { %2195 = vpow2.f32 %v1842_v51 }
 0x755   : > { %v2190_v25 = vpop.eup %2189  ;;  %2197 = vpow2.f32 %v1843_v42 }
 0x756   : > { %1347 = vrot.lane.b32.xlu1 %v2190_v25, %s2269_s29  ;;  %2199 = vpow2.f32 %v1844_v13 }
 0x757   : > { %2201 = vpow2.f32 %v1845_v59 }
 0x759   : > { %v2192_v11 = vpop.eup %2191 }
 0x75a   : > { %1349 = vrot.lane.b32.xlu0 %v2192_v11, %s2269_s29 }
 0x75d   : > { %v2194_v12 = vpop.eup %2193 }
 0x75e   : > { %1351 = vrot.lane.b32.xlu1 %v2194_v12, %s2269_s29  ;;  %v2196_v53 = vpop.eup %2195 }
 0x75f   : > { %v1277_v14 = vadd.f32 1.0, %v2196_v53  ;;  %v2198_v16 = vpop.eup %2197 }
 0x760   : > { %v1278_v17 = vadd.f32 1.0, %v2198_v16  ;;  %v2200_v19 = vpop.eup %2199 }
 0x761   : > { %2203 = vrcp.f32 %v1277_v14  ;;  %v1279_v28 = vadd.f32 1.0, %v2200_v19  ;;  %v2202_v15 = vpop.eup %2201 }
 0x762   : > { %2205 = vrcp.f32 %v1278_v17  ;;  %v1280_v57 = vadd.f32 1.0, %v2202_v15 }
 0x763   : > { %2207 = vrcp.f32 %v1279_v28 }
 0x764   : > { %2209 = vrcp.f32 %v1280_v57 }
 0x76b   : > { %v2204_v20 = vpop.eup %2203 }
 0x76c   : > { %v2206_v6 = vpop.eup %2205 }
 0x76d   : > { %v2208_v23 = vpop.eup %2207 }
 0x76e   : > { %v2210_v61 = vpop.eup %2209 }
 0x7c4   : > { %v1346_v47 = vpop.permute.xlu0 %1345 }
 0x7c5   : > { %v1357_v3 = vmul.f32 %v2204_v20, %v1346_v47 }
 0x7c7   : > { %1361 = vst.msk [vmem:[#allocation3 + $0x40] sm:$0xff] %vm482_vm0, %v1357_v3  ;;  %1886 = vmatprep.mubr.msk.f32.mxu1 %vm482_vm0, %v1357_v3 }
 0x7c8   : > { %1365 = vst.msk [vmem:[#allocation3 + $0x40] sm:$0xff] %vm507_vm3, %v1333_v45  ;;  %v1348_v10 = vpop.permute.xlu1 %1347 }
 0x7c9   : > { %v1358_v4 = vmul.f32 %v2206_v6, %v1348_v10 }
 0x7cb   : > { %1362 = vst.msk [vmem:[#allocation3 + $0x48] sm:$0xff] %vm482_vm0, %v1358_v4  ;;  %1887 = vmatmul.mubr.msk.f32.vlgmr.msra.gmra.mrb[8].mxu1 %vm482_vm0, %v1358_v4 }
 0x7cc   : > { %1366 = vst.msk [vmem:[#allocation3 + $0x48] sm:$0xff] %vm507_vm3, %v1334_v2  ;;  %v1350_v18 = vpop.permute.xlu0 %1349 }
 0x7cd   : > { %v1359_v26 = vmul.f32 %v2208_v23, %v1350_v18 }
 0x7cf   : > { %1363 = vst.msk [vmem:[#allocation3 + $0x50] sm:$0xff] %vm482_vm0, %v1359_v26  ;;  %1889 = vmatprep.mubr.msk.f32.mxu1 %vm482_vm0, %v1359_v26  ;;  %v1497_v50 = vld [vmem:[#allocation3 + $0x40] sm:$0xff] (!%p1851_p2) }
 0x7d0   : > { %1367 = vst.msk [vmem:[#allocation3 + $0x50] sm:$0xff] %vm507_vm3, %v1335_v33  ;;  %v1352_v30 = vpop.permute.xlu1 %1351  ;;  %1509 = vst [vmem:[%s2390_s10 + $0x40] sm:$0xff] (!%p1851_p2), %v1497_v50 }
 0x7d1   : > { %v1360_v31 = vmul.f32 %v2210_v61, %v1352_v30 }
 0x7d3   : > { %1364 = vst.msk [vmem:[#allocation3 + $0x58] sm:$0xff] %vm482_vm0, %v1360_v31  ;;  %1890 = vmatmul.mubr.msk.f32.gmra.mrb[10].mxu1 %vm482_vm0, %v1360_v31  ;;  %v1498_v54 = vld [vmem:[#allocation3 + $0x48] sm:$0xff] (!%p1851_p2) }
 0x7d4   : > { %1368 = vst.msk [vmem:[#allocation3 + $0x58] sm:$0xff] %vm507_vm3, %v1336_v9  ;;  %1510 = vst [vmem:[%s2390_s10 + $0x48] sm:$0xff] (!%p1851_p2), %v1498_v54 }
 0x7d7   : > { %v1499_v55 = vld [vmem:[#allocation3 + $0x50] sm:$0xff] (!%p1851_p2) }
 0x7d8   : > { %1511 = vst [vmem:[%s2390_s10 + $0x50] sm:$0xff] (!%p1851_p2), %v1499_v55 }
 0x7db   : > { %v1500_v56 = vld [vmem:[#allocation3 + $0x58] sm:$0xff] (!%p1851_p2) }
 0x7dc   : > { %1512 = vst [vmem:[%s2390_s10 + $0x58] sm:$0xff] (!%p1851_p2), %v1500_v56 }
 0x89e   : > { %v1888_v35 = vpop.f32.mrb[8].mxu1 }
 0x89f   : > { %v1468_v21 = vadd.f32 %v1888_v35, %v1846_v32  ;;  %v1462_v36 = vpop.f32.mrb[9].mxu1 }
 0x8a0   : > { %v1463_v22 = vadd.f32 %v1846_v32, %v1462_v36 }
 0x8a1   : > { %1482 = vst [vmem:[%s2388_s22 + $0x8] sm:$0xff] %v1468_v21 }
 0x8a2   : > { %1481 = vst [vmem:[%s2388_s22] sm:$0xff] %v1463_v22 }
 0x8a4   : > { %1488 = sbr.rel (%p1851_p2) target bundleno = 2219 (0x8ab), region = 90 }
 0x8a6   : > { %v1891_v37 = vpop.f32.mrb[10].mxu1 }
 0x8a7   : > { %v1478_v44 = vadd.f32 %v1891_v37, %v1846_v32  ;;  %v1472_v38 = vpop.f32.mrb[11].mxu1 }
 0x8a8   : > { %v1473_v40 = vadd.f32 %v1846_v32, %v1472_v38 }
 0x8a9   : > { %1484 = vst [vmem:[%s2388_s22 + $0x18] sm:$0xff] %v1478_v44 }
 0x8aa   : > { %1483 = vst [vmem:[%s2388_s22 + $0x10] sm:$0xff] %v1473_v40 }
 0x8ab PF: > { %1532 = sbr.rel (!%p2354_p6) target bundleno = 2227 (0x8b3), region = 98  ;;  %s1857_s26 = sshll.u32 (%p2354_p6), %s2253_s27, 5  ;;  %v1585_v58 = vld [vmem:[%s2390_s10] sm:$0xff] (%p2354_p6)  ;;  %v1587_v60 = vld [vmem:[%s2390_s10 + $0x8] sm:$0xff] (%p2354_p6)  ;;  %v1589_v45 = vld [vmem:[%s2390_s10 + $0x10] sm:$0xff] (%p2354_p6) }
 0x8ac   : > { %s1535_s15 = scalar_lea.vmem (%p2354_p6), %s3062_s7, %s1857_s26  ;;  %v1591_v63 = vld [vmem:[%s2390_s10 + $0x18] sm:$0xff] (%p2354_p6)  ;;  %v1593_v0 = vld [vmem:[%s2390_s10 + $0x20] sm:$0xff] (%p2354_p6)  ;;  %v1595_v27 = vld [vmem:[%s2390_s10 + $0x28] sm:$0xff] (%p2354_p6) }
 0x8ad   : > { %1586 = vst [vmem:[%s1535_s15] sm:$0xff] (%p2354_p6), %v1585_v58  ;;  %1588 = vst [vmem:[%s1535_s15 + $0x8] sm:$0xff] (%p2354_p6), %v1587_v60  ;;  %v1597_v62 = vld [vmem:[%s2390_s10 + $0x30] sm:$0xff] (%p2354_p6)  ;;  %v1599_v1 = vld [vmem:[%s2390_s10 + $0x38] sm:$0xff] (%p2354_p6) }
 0x8ae   : > { %1590 = vst [vmem:[%s1535_s15 + $0x10] sm:$0xff] (%p2354_p6), %v1589_v45  ;;  %1592 = vst [vmem:[%s1535_s15 + $0x18] sm:$0xff] (%p2354_p6), %v1591_v63  ;;  %v1601_v2 = vld [vmem:[%s2390_s10 + $0x40] sm:$0xff] (%p2354_p6)  ;;  %v1603_v7 = vld [vmem:[%s2390_s10 + $0x48] sm:$0xff] (%p2354_p6) }
 0x8af   : > { %1594 = vst [vmem:[%s1535_s15 + $0x40] sm:$0xff] (%p2354_p6), %v1593_v0  ;;  %1596 = vst [vmem:[%s1535_s15 + $0x48] sm:$0xff] (%p2354_p6), %v1595_v27  ;;  %v1605_v5 = vld [vmem:[%s2390_s10 + $0x50] sm:$0xff] (%p2354_p6)  ;;  %v1607_v33 = vld [vmem:[%s2390_s10 + $0x58] sm:$0xff] (%p2354_p6) }
 0x8b0   : > { %1598 = vst [vmem:[%s1535_s15 + $0x50] sm:$0xff] (%p2354_p6), %v1597_v62  ;;  %1600 = vst [vmem:[%s1535_s15 + $0x58] sm:$0xff] (%p2354_p6), %v1599_v1 }
 0x8b1   : > { %1602 = vst [vmem:[%s1535_s15 + $0x80] sm:$0xff] (%p2354_p6), %v1601_v2  ;;  %1604 = vst [vmem:[%s1535_s15 + $0x88] sm:$0xff] (%p2354_p6), %v1603_v7 }
 0x8b2   : > { %1606 = vst [vmem:[%s1535_s15 + $0x90] sm:$0xff] %v1605_v5  ;;  %1608 = vst [vmem:[%s1535_s15 + $0x98] sm:$0xff] %v1607_v33 }
 0x8b3 PF: > { %s18_s30 = sadd.s32 1, %s2265_s30   ;;  %s3071_s27 = sld [smem:[#allocation6_spill]] }
 0x8b4   : > { %p15_p3 = scmp.ge.s32.totalorder %s18_s30, 10   ;;  %s3072_s11 = sld [smem:[#allocation7_spill]] }
 0x8b5   : > { %s3073_s29 = sld [smem:[#allocation8_spill]]  ;;  %s3074_s24 = smov %s2245_s25 }
 0x8b6   : > { %s3075_s25 = smov %s2364_s14  ;;  %s3076_s26 = smov %s2257_s28 }
 0x8b7   :  { %17 = sbr.rel (!%p15_p3) target bundleno = 6 (0x6), region = 184 }
 0x8ba   : > { %s3077_s28 = smov %s3072_s11 }

</bundles_post_ra>
